<compile_context>
chip_gen: v5e
topology: v5e:2x2
jax: 0.10.0
libtpu: 0.0.40
codegen_flags: <defaults>
</compile_context>

<pallas_src>
import functools
import math

import jax
import jax.numpy as jnp
from jax.experimental import pallas as pl
from jax.experimental.pallas import tpu as pltpu


# ----------------------------------------------------------------------------
# Generation-aware VMEM budget (review items 2 & 3).
# ----------------------------------------------------------------------------
def _round_up(v, m):
    return -(-v // m) * m


@functools.lru_cache(maxsize=None)
def _vmem_limit_bytes():
    """Scoped-VMEM limit: ~54 MiB on v7x (64 MiB), ~108 MiB on v5e/v6e."""
    cap = 64 * 1024 * 1024                      # conservative default (v7x)
    try:
        cap = int(pltpu.get_tpu_info().vmem_capacity_bytes)
    except Exception:
        pass
    limit = min(int(cap * 0.85), cap - 8 * 1024 * 1024)
    return max(limit, 24 * 1024 * 1024)


def _tile_budget_bytes():
    # Headroom for Mosaic-internal scratch inside the scoped limit.
    return _vmem_limit_bytes() - 2 * 1024 * 1024


# ----------------------------------------------------------------------------
# Kernel helpers.
# ----------------------------------------------------------------------------
def _matmul_taps(view, w_ref, *, K, T, Wrow, group_kw):
    """Stride-1 conv as tap matmuls over a flat halo view (bf16 -> f32 acc).

    view: (T_in, Cx) ref view (T_in >= T + halo); Wrow is a multiple of 8 so
    the kh*Wrow tap starts are sublane-aligned.
    group_kw=True : wrapper pre-grouped kw taps along channels -> K dots of
                    contraction depth K*Cin (used for tiny Cin only).
    group_kw=False: K*K dots of contraction depth Cin.
    """
    acc = None
    if group_kw:
        for kh in range(K):
            off = kh * Wrow
            d = jnp.dot(view[off:off + T, :], w_ref[kh],
                        preferred_element_type=jnp.float32)
            acc = d if acc is None else acc + d
    else:
        for kh in range(K):
            for kw in range(K):
                off = kh * Wrow + kw
                d = jnp.dot(view[off:off + T, :], w_ref[kh * K + kw],
                            preferred_element_type=jnp.float32)
                acc = d if acc is None else acc + d
    return acc


def _valid_mask(q0, T, Wrow, Wo, rows_valid):
    """Mask of valid flat positions (excludes garbage columns / padded rows)."""
    q = q0 + jax.lax.broadcasted_iota(jnp.int32, (T, 1), 0)
    m = q < rows_valid
    if Wo != Wrow:   # flat layout carries Wrow-Wo garbage columns per image row
        m = jnp.logical_and(m, jax.lax.rem(q, Wrow) < Wo)
    return m


def _apply_act(y, act):
    if act == "relu":
        return jnp.maximum(y, 0.0)
    if act == "tanh":
        return jnp.tanh(y)
    return y


# ----------------------------------------------------------------------------
# Kernels.
# ----------------------------------------------------------------------------
def _conv_fused_kernel(x_ref, w_ref, b_ref, *rest, K, T, Wrow, Wo, rows_valid,
                       count, taps, group_kw, do_norm, act, has_residual):
    """Whole-sample fused conv + bias (+exact InstanceNorm) + act (+residual)."""
    if has_residual:
        r_ref, o_ref = rest
    else:
        (o_ref,) = rest

    if taps:
        acc = _matmul_taps(x_ref.at[0], w_ref, K=K, T=T, Wrow=Wrow,
                           group_kw=group_kw)
    else:
        acc = jnp.dot(x_ref[0], w_ref[...], preferred_element_type=jnp.float32)
    acc = acc + b_ref[...].astype(jnp.float32)

    if do_norm:
        mask = _valid_mask(0, T, Wrow, Wo, rows_valid)
        am = jnp.where(mask, acc, 0.0)
        inv = 1.0 / float(count)
        s = jnp.sum(am, axis=0, keepdims=True)
        ss = jnp.sum(am * am, axis=0, keepdims=True)
        mean = s * inv
        var = jnp.maximum(ss * inv - mean * mean, 0.0)
        acc = (acc - mean) * jax.lax.rsqrt(var + 1e-5)

    acc = _apply_act(acc, act)
    if has_residual:
        acc = acc + r_ref[0].astype(jnp.float32)
    o_ref[0] = acc.astype(o_ref.dtype)


def _conv_dma_kernel(x_hbm, w_ref, b_ref, *rest, K, T, T_in, Wrow, Wo,
                     rows_valid, L_pad, taps, group_kw, do_norm, act):
    """Multi-tile conv: the flat activation stays in HBM and the overlapping
    halo window [t*T, t*T+T_in) is DMA'd in-kernel with a 2-deep double buffer
    (review item 1).  do_norm=True -> writes pre-norm tile + per-channel
    [sum, sumsq] stats; do_norm=False -> bias + activation + store."""
    if do_norm:
        pre_ref, stats_ref, buf, sem = rest
    else:
        o_ref, buf, sem = rest

    n = pl.program_id(0)
    t = pl.program_id(1)
    nt = pl.num_programs(1)
    slot = jax.lax.rem(t, 2)

    def copy_desc(tile_idx, sl):
        start = pl.multiple_of(n * L_pad + tile_idx * T, 8)
        return pltpu.make_async_copy(x_hbm.at[pl.ds(start, T_in)],
                                     buf.at[sl], sem.at[sl])

    @pl.when(t == 0)                      # prime the first window per sample
    def _():
        copy_desc(0, 0).start()

    copy_desc(t, slot).wait()

    @pl.when(t + 1 < nt)                  # prefetch next window
    def _():
        copy_desc(t + 1, 1 - slot).start()

    view = buf.at[slot]
    if taps:
        acc = _matmul_taps(view, w_ref, K=K, T=T, Wrow=Wrow, group_kw=group_kw)
    else:
        acc = jnp.dot(view[0:T, :], w_ref[...],
                      preferred_element_type=jnp.float32)
    acc = acc + b_ref[...].astype(jnp.float32)

    if do_norm:
        pre_ref[0] = acc.astype(pre_ref.dtype)
        mask = _valid_mask(t * T, T, Wrow, Wo, rows_valid)
        am = jnp.where(mask, acc, 0.0)
        s = jnp.sum(am, axis=0, keepdims=True)
        ss = jnp.sum(am * am, axis=0, keepdims=True)
        tile_stats = jnp.concatenate([s, ss], axis=0)[None]   # (1, 2, Cout)

        @pl.when(t == 0)
        def _():
            stats_ref[...] = jnp.zeros_like(stats_ref)

        stats_ref[...] += tile_stats
    else:
        o_ref[0] = _apply_act(acc, act).astype(o_ref.dtype)


def _norm_act_kernel(pre_ref, stats_ref, *rest, count, act, has_residual):
    """Pass 2 of the tiled InstanceNorm: normalize + activation (+residual)."""
    if has_residual:
        r_ref, o_ref = rest
    else:
        (o_ref,) = rest

    acc = pre_ref[0].astype(jnp.float32)
    st = stats_ref[0].astype(jnp.float32)                    # (2, Cout)
    inv = 1.0 / float(count)
    mean = st[0:1, :] * inv
    var = jnp.maximum(st[1:2, :] * inv - mean * mean, 0.0)
    y = (acc - mean) * jax.lax.rsqrt(var + 1e-5)
    y = _apply_act(y, act)
    if has_residual:
        y = y + r_ref[0].astype(jnp.float32)
    o_ref[0] = y.astype(o_ref.dtype)


# ----------------------------------------------------------------------------
# Wrapper-side layout plumbing (plain JAX glue).
# ----------------------------------------------------------------------------
def _im2col_strided(xp, K, stride, Ho, Wo):
    """Folded im2col for the two stride-2 convs: (N, Ho*Wo, K*K*C)."""
    # TODO(synk): do the stride-2 taps in-kernel (pl.ds(..., stride=2)) to avoid
    # materializing the 2.25x patches tensor for down1/down2.
    N, Hp, Wp, C = xp.shape
    cols = []
    for kh in range(K):
        for kw in range(K):
            cols.append(jax.lax.slice(
                xp, (0, kh, kw, 0),
                (N, kh + stride * (Ho - 1) + 1, kw + stride * (Wo - 1) + 1, C),
                (1, stride, stride, 1)))
    patches = jnp.concatenate(cols, axis=-1)
    return patches.reshape(N, Ho * Wo, K * K * C)


def _to_flat_rows(a, Wrow, rows_pad):
    """(N, Ho, Wo, C) -> (N, rows_pad, C) in the padded-width flat layout."""
    N, Ho, Wo, C = a.shape
    if Wrow != Wo:
        a = jnp.pad(a, ((0, 0), (0, 0), (0, Wrow - Wo), (0, 0)))
    a = a.reshape(N, Ho * Wrow, C)
    if rows_pad > Ho * Wrow:
        a = jnp.pad(a, ((0, 0), (0, rows_pad - Ho * Wrow), (0, 0)))
    return a


def _from_flat_rows(y, Ho, Wrow, Wo):
    N = y.shape[0]
    y = y[:, :Ho * Wrow, :].reshape(N, Ho, Wrow, y.shape[-1])
    return y[:, :, :Wo, :]


def conv_layer(x, w, b, *, stride=1, pad=0, pad_mode="zero", do_norm=True,
               act="none", residual=None, out_dtype=jnp.bfloat16,
               max_tile_rows=None):
    """Conv2d (+InstanceNorm2d(affine=False, eps=1e-5) +ReLU/Tanh, +residual).

    x: (N, H, W, Cin); w: (K, K, Cin, Cout) f32; b: (Cout,) f32.
    """
    x = x.astype(jnp.bfloat16)
    if pad > 0:
        mode = "reflect" if pad_mode == "reflect" else "constant"
        x = jnp.pad(x, ((0, 0), (pad, pad), (pad, pad), (0, 0)), mode=mode)

    N, Hp, Wp, Cin = x.shape
    K = w.shape[0]
    Cout = w.shape[3]
    wb = w.astype(jnp.bfloat16)
    b_in = b.reshape(1, Cout).astype(jnp.float32)
    out_bytes = jnp.dtype(out_dtype).itemsize
    has_res = residual is not None

    taps = (stride == 1)
    if taps:
        Ho, Wo = Hp - K + 1, Wp - K + 1
        # Sublane-aligned padded row width: kh*Wrow tap starts stay 8-aligned.
        Wrow = _round_up(Wp, 8)
        if Wrow != Wp:
            x = jnp.pad(x, ((0, 0), (0, 0), (0, Wrow - Wp), (0, 0)))
        group_kw = Cin <= 16       # tiny Cin only: kw duplication is cheap
        Cx = K * Cin if group_kw else Cin
        halo = (K - 1) * Wrow if group_kw else (K - 1) * Wrow + (K - 1)
        halo = _round_up(halo, 8)
        rows_valid = Ho * Wrow
    else:
        Ho = (Hp - K) // stride + 1
        Wo = (Wp - K) // stride + 1
        Wrow = Wo
        group_kw = False
        Cx = K * K * Cin
        halo = 0
        rows_valid = Ho * Wo
    count = Ho * Wo                # valid spatial positions for InstanceNorm

    # ---- exact-ish VMEM accounting: whole-sample fused tile whenever it fits.
    budget = _tile_budget_bytes() - 4 * K * K * Cin * Cout   # 2x bf16 weights

    def fused_bytes(t_rows):
        byt = 2 * (t_rows + halo) * Cx * 2               # input (2 buffers)
        byt += 2 * t_rows * Cout * out_bytes             # output (2 buffers)
        byt += 2 * t_rows * Cout * 2 if has_res else 0   # residual (2 buffers)
        byt += (5 * t_rows * Cout * 4) // 2              # f32 acc + temporaries
        return byt

    T0 = _round_up(rows_valid, 8)
    single = fused_bytes(T0) <= budget
    if max_tile_rows is not None:
        single = single and T0 <= _round_up(max_tile_rows, 8)

    def flat_taps(length_rows):
        """Flat (N, length_rows, Cx) padded-width activation (kw-grouped if
        requested), zero padded at the tail."""
        xf = x.reshape(N, Hp * Wrow, Cin)
        if group_kw:
            need = length_rows + (K - 1)
            xf = jnp.pad(xf, ((0, 0), (0, max(0, need - Hp * Wrow)), (0, 0)))
            xf = jnp.concatenate(
                [jax.lax.slice_in_dim(xf, kw, kw + length_rows, axis=1)
                 for kw in range(K)], axis=-1)            # (N, L, K*Cin)
        else:
            xf = jnp.pad(xf, ((0, 0),
                              (0, max(0, length_rows - Hp * Wrow)), (0, 0)))
        return xf

    if taps and group_kw:
        w_in = wb.reshape(K, K * Cin, Cout)
    elif taps:
        w_in = wb.reshape(K * K, Cin, Cout)
    else:
        w_in = wb.reshape(K * K * Cin, Cout)
    w_spec = pl.BlockSpec(w_in.shape, lambda *_: (0,) * w_in.ndim)
    b_spec = pl.BlockSpec((1, Cout), lambda *_: (0, 0))

    def cparams(sem):
        return pltpu.CompilerParams(dimension_semantics=sem,
                                    vmem_limit_bytes=_vmem_limit_bytes())

    # ------------------------------------------------------------------ single
    if single:
        T = T0
        T_in = T + halo if taps else T
        if taps:
            x_in = flat_taps(T_in)                        # no halo re-stacking
        else:
            patches = _im2col_strided(x, K, stride, Ho, Wo)
            x_in = jnp.pad(patches, ((0, 0), (0, T - rows_valid), (0, 0)))
        x_spec = pl.BlockSpec((1, T_in, Cx), lambda n: (n, 0, 0))
        row_spec = pl.BlockSpec((1, T, Cout), lambda n: (n, 0, 0))

        in_specs = [x_spec, w_spec, b_spec]
        args = [x_in, w_in, b_in]
        if has_res:
            in_specs.append(row_spec)
            args.append(_to_flat_rows(residual.astype(jnp.bfloat16), Wrow, T))

        kern = functools.partial(
            _conv_fused_kernel, K=K, T=T, Wrow=Wrow, Wo=Wo,
            rows_valid=rows_valid, count=count, taps=taps, group_kw=group_kw,
            do_norm=do_norm, act=act, has_residual=has_res)
        # TODO(synk): on v7x with N=1 split the sample across the 2 TensorCores
        # (per-core partial stats + combine) instead of leaving one core idle.
        y = pl.pallas_call(
            kern, grid=(N,),
            in_specs=in_specs, out_specs=row_spec,
            out_shape=jax.ShapeDtypeStruct((N, T, Cout), out_dtype),
            compiler_params=cparams(("parallel",)),
        )(*args)
        return _from_flat_rows(y, Ho, Wrow, Wo)

    # -------------------------------------------------------------- multi-tile
    pre_bytes = 2 if do_norm else out_bytes
    per_row = 2 * Cx * 2 + 2 * Cout * pre_bytes + (5 * Cout * 4) // 2
    fixed = 2 * halo * Cx * 2
    T = max(8, ((budget - fixed) // max(per_row, 1)) // 8 * 8)
    if max_tile_rows is not None:
        T = min(T, max(8, _round_up(max_tile_rows, 8)))
    T = min(T, T0)
    n_tiles = -(-rows_valid // T)
    rows_pad = n_tiles * T
    T_in = T + halo
    L_pad = (n_tiles - 1) * T + T_in

    if taps:
        x_in = flat_taps(L_pad).reshape(N * L_pad, Cx)
    else:
        patches = _im2col_strided(x, K, stride, Ho, Wo)
        patches = jnp.pad(patches, ((0, 0), (0, L_pad - rows_valid), (0, 0)))
        x_in = patches.reshape(N * L_pad, Cx)

    any_spec = pl.BlockSpec(memory_space=pl.ANY)          # stays in HBM
    row_spec = pl.BlockSpec((1, T, Cout), lambda n, t: (n, t, 0))
    stats_spec = pl.BlockSpec((1, 2, Cout), lambda n, t: (n, 0, 0))
    scratch = [pltpu.VMEM((2, T_in, Cx), jnp.bfloat16),
               pltpu.SemaphoreType.DMA((2,))]

    kern1 = functools.partial(
        _conv_dma_kernel, K=K, T=T, T_in=T_in, Wrow=Wrow, Wo=Wo,
        rows_valid=rows_valid, L_pad=L_pad, taps=taps, group_kw=group_kw,
        do_norm=do_norm, act=act)

    if do_norm:
        pre, stats = pl.pallas_call(
            kern1, grid=(N, n_tiles),
            in_specs=[any_spec, w_spec, b_spec],
            out_specs=[row_spec, stats_spec],
            out_shape=[jax.ShapeDtypeStruct((N, rows_pad, Cout), jnp.bfloat16),
                       jax.ShapeDtypeStruct((N, 2, Cout), jnp.float32)],
            scratch_shapes=scratch,
            compiler_params=cparams(("arbitrary", "arbitrary")),
        )(x_in, w_in, b_in)

        kern2 = functools.partial(_norm_act_kernel, count=count, act=act,
                                  has_residual=has_res)
        in_specs = [row_spec, stats_spec]
        args2 = [pre, stats]
        if has_res:
            in_specs.append(row_spec)
            args2.append(_to_flat_rows(residual.astype(jnp.bfloat16), Wrow,
                                       rows_pad))
        # TODO(synk): bump the pre/residual input pipelining depth with
        # pipeline_mode=pl.Buffered(3) for this purely streaming pass.
        y = pl.pallas_call(
            kern2, grid=(N, n_tiles),
            in_specs=in_specs, out_specs=row_spec,
            out_shape=jax.ShapeDtypeStruct((N, rows_pad, Cout), out_dtype),
            compiler_params=cparams(("parallel", "parallel")),
        )(*args2)
    else:
        y = pl.pallas_call(
            kern1, grid=(N, n_tiles),
            in_specs=[any_spec, w_spec, b_spec],
            out_specs=row_spec,
            out_shape=jax.ShapeDtypeStruct((N, rows_pad, Cout), out_dtype),
            scratch_shapes=scratch,
            compiler_params=cparams(("arbitrary", "arbitrary")),
        )(x_in, w_in, b_in)
        if has_res:
            # TODO(synk): fold the residual add into the kernel for this rare
            # (multi-tile, no-norm, residual) combination.
            y = (y.astype(jnp.float32)
                 + _to_flat_rows(residual, Wrow, rows_pad).astype(jnp.float32)
                 ).astype(out_dtype)
    return _from_flat_rows(y, Ho, Wrow, Wo)


# ----------------------------------------------------------------------------
# GeneratorResNet forward (semantics of the PyTorch module).
# ----------------------------------------------------------------------------
def generator_resnet(x_nchw, params, in_channels=3, num_residual_blocks=9):
    C = in_channels
    x = jnp.transpose(x_nchw, (0, 2, 3, 1)).astype(jnp.bfloat16)   # NCHW->NHWC

    # Pad input channels to 8 (lane-friendlier loads); weights padded to match.
    cpad = (-C) % 8
    init_w = params["init_w"]
    if cpad:
        x = jnp.pad(x, ((0, 0), (0, 0), (0, 0), (0, cpad)))
        init_w = jnp.pad(init_w, ((0, 0), (0, 0), (0, cpad), (0, 0)))

    # initial: ReflectionPad(C) -> Conv(C,64,2C+1) -> IN -> ReLU
    x = conv_layer(x, init_w, params["init_b"], stride=1, pad=C,
                   pad_mode="reflect", do_norm=True, act="relu")

    # downsample: Conv(64,128,3,s2,p1)+IN+ReLU, Conv(128,256,3,s2,p1)+IN+ReLU
    x = conv_layer(x, params["down1_w"], params["down1_b"], stride=2, pad=1,
                   pad_mode="zero", do_norm=True, act="relu")
    x = conv_layer(x, params["down2_w"], params["down2_b"], stride=2, pad=1,
                   pad_mode="zero", do_norm=True, act="relu")

    # residual blocks: x + IN(Conv(ReLU(IN(Conv(reflpad(x)))))) with refl pads
    # TODO(synk): keep activations in the flat padded-width layout across the
    # residual stack (emit already-padded output) to drop the per-layer
    # slice+pad wrapper passes.
    for i in range(num_residual_blocks):
        h = conv_layer(x, params[f"res{i}_w1"], params[f"res{i}_b1"], stride=1,
                       pad=1, pad_mode="reflect", do_norm=True, act="relu")
        x = conv_layer(h, params[f"res{i}_w2"], params[f"res{i}_b2"], stride=1,
                       pad=1, pad_mode="reflect", do_norm=True, act="none",
                       residual=x)

    # TODO(synk): fuse the 2x nearest upsample into the following conv (phase
    # decomposition / in-VMEM expansion) to avoid materializing the 4x larger
    # activation in HBM for these two stages.
    x = jnp.repeat(jnp.repeat(x, 2, axis=1), 2, axis=2)
    x = conv_layer(x, params["up1_w"], params["up1_b"], stride=1, pad=1,
                   pad_mode="zero", do_norm=True, act="relu")
    x = jnp.repeat(jnp.repeat(x, 2, axis=1), 2, axis=2)
    x = conv_layer(x, params["up2_w"], params["up2_b"], stride=1, pad=1,
                   pad_mode="zero", do_norm=True, act="relu")

    # output: ReflectionPad(C) -> Conv(64,C,2C+1) -> Tanh
    # (output channels padded to 8; kept small on purpose so the f32 output
    #  write stays under the HBM roofline, sliced back below)
    opad = (-C) % 8
    out_w = jnp.pad(params["out_w"], ((0, 0), (0, 0), (0, 0), (0, opad)))
    out_b = jnp.pad(params["out_b"], ((0, opad),))
    y = conv_layer(x, out_w, out_b, stride=1, pad=C, pad_mode="reflect",
                   do_norm=False, act="tanh", out_dtype=jnp.float32)
    y = y[..., :C]
    return jnp.transpose(y, (0, 3, 1, 2))                    # NHWC -> NCHW


# ----------------------------------------------------------------------------
# Deterministic synthetic parameters (shapes from GeneratorResNet.__init__).
# ----------------------------------------------------------------------------
def init_params(seed=0, in_channels=3, num_residual_blocks=9):
    key = jax.random.PRNGKey(seed)

    def conv_init(k, K, cin, cout):
        kw, kb = jax.random.split(k)
        scale = 1.0 / math.sqrt(K * K * cin)
        w = jax.random.normal(kw, (K, K, cin, cout), jnp.float32) * scale
        bb = jax.random.normal(kb, (cout,), jnp.float32) * 0.01
        return w, bb

    K0 = 2 * in_channels + 1
    keys = jax.random.split(key, 6 + 2 * num_residual_blocks)
    p = {}
    p["init_w"], p["init_b"] = conv_init(keys[0], K0, in_channels, 64)
    p["down1_w"], p["down1_b"] = conv_init(keys[1], 3, 64, 128)
    p["down2_w"], p["down2_b"] = conv_init(keys[2], 3, 128, 256)
    for i in range(num_residual_blocks):
        p[f"res{i}_w1"], p[f"res{i}_b1"] = conv_init(keys[3 + 2 * i], 3, 256, 256)
        p[f"res{i}_w2"], p[f"res{i}_b2"] = conv_init(keys[4 + 2 * i], 3, 256, 256)
    base = 3 + 2 * num_residual_blocks
    p["up1_w"], p["up1_b"] = conv_init(keys[base], 3, 256, 128)
    p["up2_w"], p["up2_b"] = conv_init(keys[base + 1], 3, 128, 64)
    p["out_w"], p["out_b"] = conv_init(keys[base + 2], K0, 64, in_channels)
    return p


# ----------------------------------------------------------------------------
# Pure-JAX references (for correctness checks only).
# ----------------------------------------------------------------------------
def _ref_conv_layer(x, w, b, *, stride=1, pad=0, pad_mode="zero", do_norm=True,
                    act="none", residual=None):
    xf = x.astype(jnp.float32)
    if pad > 0:
        mode = "reflect" if pad_mode == "reflect" else "constant"
        xf = jnp.pad(xf, ((0, 0), (pad, pad), (pad, pad), (0, 0)), mode=mode)
    y = jax.lax.conv_general_dilated(
        xf, w.astype(jnp.float32), (stride, stride), "VALID",
        dimension_numbers=("NHWC", "HWIO", "NHWC"),
        precision=jax.lax.Precision.HIGHEST)
    y = y + b.astype(jnp.float32)
    if do_norm:
        m = jnp.mean(y, axis=(1, 2), keepdims=True)
        v = jnp.mean(jnp.square(y - m), axis=(1, 2), keepdims=True)
        y = (y - m) * jax.lax.rsqrt(v + 1e-5)
    if act == "relu":
        y = jnp.maximum(y, 0.0)
    elif act == "tanh":
        y = jnp.tanh(y)
    if residual is not None:
        y = y + residual.astype(jnp.float32)
    return y


def _ref_generator(x_nchw, params, in_channels=3, num_residual_blocks=9):
    C = in_channels
    x = jnp.transpose(x_nchw, (0, 2, 3, 1)).astype(jnp.float32)
    x = _ref_conv_layer(x, params["init_w"], params["init_b"], pad=C,
                        pad_mode="reflect", act="relu")
    x = _ref_conv_layer(x, params["down1_w"], params["down1_b"], stride=2,
                        pad=1, act="relu")
    x = _ref_conv_layer(x, params["down2_w"], params["down2_b"], stride=2,
                        pad=1, act="relu")
    for i in range(num_residual_blocks):
        h = _ref_conv_layer(x, params[f"res{i}_w1"], params[f"res{i}_b1"],
                            pad=1, pad_mode="reflect", act="relu")
        x = _ref_conv_layer(h, params[f"res{i}_w2"], params[f"res{i}_b2"],
                            pad=1, pad_mode="reflect", act="none", residual=x)
    x = jnp.repeat(jnp.repeat(x, 2, axis=1), 2, axis=2)
    x = _ref_conv_layer(x, params["up1_w"], params["up1_b"], pad=1, act="relu")
    x = jnp.repeat(jnp.repeat(x, 2, axis=1), 2, axis=2)
    x = _ref_conv_layer(x, params["up2_w"], params["up2_b"], pad=1, act="relu")
    x = _ref_conv_layer(x, params["out_w"], params["out_b"], pad=C,
                        pad_mode="reflect", do_norm=False, act="tanh")
    return jnp.transpose(x, (0, 3, 1, 2))


if __name__ == "__main__":
    IN_CHANNELS = 3
    N_RES = 9
    N, H, W = 2, 16, 16

    # ---------------- unit checks: each kernel path vs pure-JAX reference ----
    ks = jax.random.split(jax.random.PRNGKey(1), 12)

    def _max_err(a, ref):
        return float(jnp.max(jnp.abs(a.astype(jnp.float32) - ref)))

    # (1) whole-sample fused path, per-tap dots (Cin >= 64), IN + ReLU
    x1 = jax.random.normal(ks[0], (2, 8, 8, 128), jnp.float32).astype(jnp.bfloat16)
    w1 = jax.random.normal(ks[1], (3, 3, 128, 64), jnp.float32) * 0.05
    c1 = jax.random.normal(ks[2], (64,), jnp.float32) * 0.05
    got1 = jax.jit(lambda a, ww, bb: conv_layer(
        a, ww, bb, pad=1, pad_mode="reflect", do_norm=True, act="relu"))(x1, w1, c1)
    ref1 = _ref_conv_layer(x1, w1.astype(jnp.bfloat16), c1, pad=1,
                           pad_mode="reflect", do_norm=True, act="relu")
    e1 = _max_err(got1, ref1)
    assert e1 < 0.1, f"fused conv path max err {e1}"

    # (2) multi-tile (manual halo DMA) two-pass InstanceNorm path + residual
    x2 = jax.random.normal(ks[3], (2, 16, 16, 16), jnp.float32).astype(jnp.bfloat16)
    r2 = jax.random.normal(ks[4], (2, 16, 16, 16), jnp.float32).astype(jnp.bfloat16)
    w2 = jax.random.normal(ks[5], (3, 3, 16, 16), jnp.float32) * 0.1
    c2 = jax.random.normal(ks[6], (16,), jnp.float32) * 0.1
    got2 = jax.jit(lambda a, ww, bb, rr: conv_layer(
        a, ww, bb, pad=1, pad_mode="reflect", do_norm=True, act="none",
        residual=rr, max_tile_rows=64))(x2, w2, c2, r2)
    ref2 = _ref_conv_layer(x2, w2.astype(jnp.bfloat16), c2, pad=1,
                           pad_mode="reflect", do_norm=True, act="none",
                           residual=r2)
    e2 = _max_err(got2, ref2)
    assert e2 < 0.1, f"tiled (DMA) conv path max err {e2}"

    # (3) stride-2 (pre-formed patches) path, IN + ReLU
    w3 = jax.random.normal(ks[7], (3, 3, 16, 32), jnp.float32) * 0.1
    c3 = jax.random.normal(ks[8], (32,), jnp.float32) * 0.1
    got3 = jax.jit(lambda a, ww, bb: conv_layer(
        a, ww, bb, stride=2, pad=1, pad_mode="zero", do_norm=True,
        act="relu"))(x2, w3, c3)
    ref3 = _ref_conv_layer(x2, w3.astype(jnp.bfloat16), c3, stride=2, pad=1,
                           do_norm=True, act="relu")
    e3 = _max_err(got3, ref3)
    assert e3 < 0.1, f"strided conv path max err {e3}"

    # (4) multi-tile (manual halo DMA), no-norm fused conv + tanh
    x4 = jax.random.normal(ks[9], (2, 16, 16, 64), jnp.float32).astype(jnp.bfloat16)
    w4 = jax.random.normal(ks[10], (3, 3, 64, 8), jnp.float32) * 0.05
    c4 = jax.random.normal(ks[11], (8,), jnp.float32) * 0.05
    got4 = jax.jit(lambda a, ww, bb: conv_layer(
        a, ww, bb, pad=1, pad_mode="zero", do_norm=False, act="tanh",
        max_tile_rows=64))(x4, w4, c4)
    ref4 = _ref_conv_layer(x4, w4.astype(jnp.bfloat16), c4, pad=1,
                           do_norm=False, act="tanh")
    e4 = _max_err(got4, ref4)
    assert e4 < 0.1, f"no-norm tiled (DMA) conv path max err {e4}"

    # ---------------- full GeneratorResNet forward ----------------
    key = jax.random.PRNGKey(0)
    x = jax.random.normal(key, (N, IN_CHANNELS, H, W), jnp.float32)  # NCHW
    params = init_params(seed=0, in_channels=IN_CHANNELS,
                         num_residual_blocks=N_RES)

    fwd = jax.jit(functools.partial(generator_resnet, in_channels=IN_CHANNELS,
                                    num_residual_blocks=N_RES))
    out = jax.block_until_ready(fwd(x, params))

    assert out.shape == (N, IN_CHANNELS, H, W), out.shape
    assert out.dtype == jnp.float32
    assert bool(jnp.all(jnp.isfinite(out)))
    assert bool(jnp.all(jnp.abs(out) <= 1.0))        # tanh output range

    # end-to-end sanity vs f32 reference (bf16 activations -> loose tolerance)
    ref_out = _ref_generator(x, params, in_channels=IN_CHANNELS,
                             num_residual_blocks=N_RES)
    mean_err = float(jnp.mean(jnp.abs(out - ref_out)))
    assert mean_err < 0.25, f"end-to-end mean abs err {mean_err}"

    print("KERNEL_OK")
</pallas_src>

<mosaic_0001>
module attributes {stable_mosaic.version = 11 : i64} {
  func.func @_conv_fused_kernel(%arg0: i32, %arg1: memref<1x168x128xbf16, #tpu.memory_space<vmem>>, %arg2: memref<9x128x64xbf16, #tpu.memory_space<vmem>>, %arg3: memref<1x64xf32, #tpu.memory_space<vmem>>, %arg4: memref<1x128x64xbf16, #tpu.memory_space<vmem>>) attributes {dimension_semantics = [#tpu.dimension_semantics<parallel>], iteration_bounds = array<i64: 2>, scalar_prefetch = 0 : i64, scratch_operands = 0 : i64, tpu.core_type = #tpu.core_type<tc>, window_params = [{transform_indices = @transform_0, window_bounds = array<i64: 1, 168, 128>}, {pipeline_mode = #tpu.pipeline_mode<synchronous>, transform_indices = @transform_1, window_bounds = array<i64: 9, 128, 64>}, {pipeline_mode = #tpu.pipeline_mode<synchronous>, transform_indices = @transform_2, window_bounds = array<i64: 1, 64>}, {transform_indices = @transform_3, window_bounds = array<i64: 1, 128, 64>}]} {
    %c0_i32 = arith.constant 0 : i32
    %c0_i32_0 = arith.constant 0 : i32
    %c0_i32_1 = arith.constant 0 : i32
    %0 = tpu.memref_slice %arg1[%c0_i32, %c0_i32_0, %c0_i32_1] : memref<1x168x128xbf16, #tpu.memory_space<vmem>> -> memref<1x168x128xbf16, #tpu.memory_space<vmem>>
    %1 = tpu.memref_squeeze %0 : memref<1x168x128xbf16, #tpu.memory_space<vmem>> -> memref<168x128xbf16, #tpu.memory_space<vmem>>
    %c0 = arith.constant 0 : index
    %c0_2 = arith.constant 0 : index
    %2 = vector.load %1[%c0, %c0_2] : memref<168x128xbf16, #tpu.memory_space<vmem>>, vector<128x128xbf16>
    %c0_3 = arith.constant 0 : index
    %c0_4 = arith.constant 0 : index
    %c0_5 = arith.constant 0 : index
    %3 = vector.load %arg2[%c0_3, %c0_4, %c0_5] : memref<9x128x64xbf16, #tpu.memory_space<vmem>>, vector<1x128x64xbf16>
    %4 = vector.shape_cast %3 : vector<1x128x64xbf16> to vector<128x64xbf16>
    %cst = arith.constant dense<0.000000e+00> : vector<128x64xf32>
    %5 = tpu.matmul %2, %4, %cst {dimension_numbers = #tpu.dot_dimension_numbers<[1], [0], [0], [1], [0, 0, 1, 1], [], []>} : vector<128x128xbf16>, vector<128x64xbf16>, vector<128x64xf32> -> vector<128x64xf32>
    %c0_i32_6 = arith.constant 0 : i32
    %c0_i32_7 = arith.constant 0 : i32
    %c0_i32_8 = arith.constant 0 : i32
    %6 = tpu.memref_slice %arg1[%c0_i32_6, %c0_i32_7, %c0_i32_8] : memref<1x168x128xbf16, #tpu.memory_space<vmem>> -> memref<1x168x128xbf16, #tpu.memory_space<vmem>>
    %7 = tpu.memref_squeeze %6 : memref<1x168x128xbf16, #tpu.memory_space<vmem>> -> memref<168x128xbf16, #tpu.memory_space<vmem>>
    %c1 = arith.constant 1 : index
    %c0_9 = arith.constant 0 : index
    %8 = vector.load %7[%c1, %c0_9] : memref<168x128xbf16, #tpu.memory_space<vmem>>, vector<128x128xbf16>
    %c1_10 = arith.constant 1 : index
    %c0_11 = arith.constant 0 : index
    %c0_12 = arith.constant 0 : index
    %9 = vector.load %arg2[%c1_10, %c0_11, %c0_12] : memref<9x128x64xbf16, #tpu.memory_space<vmem>>, vector<1x128x64xbf16>
    %10 = vector.shape_cast %9 : vector<1x128x64xbf16> to vector<128x64xbf16>
    %cst_13 = arith.constant dense<0.000000e+00> : vector<128x64xf32>
    %11 = tpu.matmul %8, %10, %cst_13 {dimension_numbers = #tpu.dot_dimension_numbers<[1], [0], [0], [1], [0, 0, 1, 1], [], []>} : vector<128x128xbf16>, vector<128x64xbf16>, vector<128x64xf32> -> vector<128x64xf32>
    %12 = arith.addf %5, %11 : vector<128x64xf32>
    %c0_i32_14 = arith.constant 0 : i32
    %c0_i32_15 = arith.constant 0 : i32
    %c0_i32_16 = arith.constant 0 : i32
    %13 = tpu.memref_slice %arg1[%c0_i32_14, %c0_i32_15, %c0_i32_16] : memref<1x168x128xbf16, #tpu.memory_space<vmem>> -> memref<1x168x128xbf16, #tpu.memory_space<vmem>>
    %14 = tpu.memref_squeeze %13 : memref<1x168x128xbf16, #tpu.memory_space<vmem>> -> memref<168x128xbf16, #tpu.memory_space<vmem>>
    %c2 = arith.constant 2 : index
    %c0_17 = arith.constant 0 : index
    %15 = vector.load %14[%c2, %c0_17] : memref<168x128xbf16, #tpu.memory_space<vmem>>, vector<128x128xbf16>
    %c2_18 = arith.constant 2 : index
    %c0_19 = arith.constant 0 : index
    %c0_20 = arith.constant 0 : index
    %16 = vector.load %arg2[%c2_18, %c0_19, %c0_20] : memref<9x128x64xbf16, #tpu.memory_space<vmem>>, vector<1x128x64xbf16>
    %17 = vector.shape_cast %16 : vector<1x128x64xbf16> to vector<128x64xbf16>
    %cst_21 = arith.constant dense<0.000000e+00> : vector<128x64xf32>
    %18 = tpu.matmul %15, %17, %cst_21 {dimension_numbers = #tpu.dot_dimension_numbers<[1], [0], [0], [1], [0, 0, 1, 1], [], []>} : vector<128x128xbf16>, vector<128x64xbf16>, vector<128x64xf32> -> vector<128x64xf32>
    %19 = arith.addf %12, %18 : vector<128x64xf32>
    %c0_i32_22 = arith.constant 0 : i32
    %c0_i32_23 = arith.constant 0 : i32
    %c0_i32_24 = arith.constant 0 : i32
    %20 = tpu.memref_slice %arg1[%c0_i32_22, %c0_i32_23, %c0_i32_24] : memref<1x168x128xbf16, #tpu.memory_space<vmem>> -> memref<1x168x128xbf16, #tpu.memory_space<vmem>>
    %21 = tpu.memref_squeeze %20 : memref<1x168x128xbf16, #tpu.memory_space<vmem>> -> memref<168x128xbf16, #tpu.memory_space<vmem>>
    %c16 = arith.constant 16 : index
    %c0_25 = arith.constant 0 : index
    %22 = vector.load %21[%c16, %c0_25] : memref<168x128xbf16, #tpu.memory_space<vmem>>, vector<128x128xbf16>
    %c3 = arith.constant 3 : index
    %c0_26 = arith.constant 0 : index
    %c0_27 = arith.constant 0 : index
    %23 = vector.load %arg2[%c3, %c0_26, %c0_27] : memref<9x128x64xbf16, #tpu.memory_space<vmem>>, vector<1x128x64xbf16>
    %24 = vector.shape_cast %23 : vector<1x128x64xbf16> to vector<128x64xbf16>
    %cst_28 = arith.constant dense<0.000000e+00> : vector<128x64xf32>
    %25 = tpu.matmul %22, %24, %cst_28 {dimension_numbers = #tpu.dot_dimension_numbers<[1], [0], [0], [1], [0, 0, 1, 1], [], []>} : vector<128x128xbf16>, vector<128x64xbf16>, vector<128x64xf32> -> vector<128x64xf32>
    %26 = arith.addf %19, %25 : vector<128x64xf32>
    %c0_i32_29 = arith.constant 0 : i32
    %c0_i32_30 = arith.constant 0 : i32
    %c0_i32_31 = arith.constant 0 : i32
    %27 = tpu.memref_slice %arg1[%c0_i32_29, %c0_i32_30, %c0_i32_31] : memref<1x168x128xbf16, #tpu.memory_space<vmem>> -> memref<1x168x128xbf16, #tpu.memory_space<vmem>>
    %28 = tpu.memref_squeeze %27 : memref<1x168x128xbf16, #tpu.memory_space<vmem>> -> memref<168x128xbf16, #tpu.memory_space<vmem>>
    %c17 = arith.constant 17 : index
    %c0_32 = arith.constant 0 : index
    %29 = vector.load %28[%c17, %c0_32] : memref<168x128xbf16, #tpu.memory_space<vmem>>, vector<128x128xbf16>
    %c4 = arith.constant 4 : index
    %c0_33 = arith.constant 0 : index
    %c0_34 = arith.constant 0 : index
    %30 = vector.load %arg2[%c4, %c0_33, %c0_34] : memref<9x128x64xbf16, #tpu.memory_space<vmem>>, vector<1x128x64xbf16>
    %31 = vector.shape_cast %30 : vector<1x128x64xbf16> to vector<128x64xbf16>
    %cst_35 = arith.constant dense<0.000000e+00> : vector<128x64xf32>
    %32 = tpu.matmul %29, %31, %cst_35 {dimension_numbers = #tpu.dot_dimension_numbers<[1], [0], [0], [1], [0, 0, 1, 1], [], []>} : vector<128x128xbf16>, vector<128x64xbf16>, vector<128x64xf32> -> vector<128x64xf32>
    %33 = arith.addf %26, %32 : vector<128x64xf32>
    %c0_i32_36 = arith.constant 0 : i32
    %c0_i32_37 = arith.constant 0 : i32
    %c0_i32_38 = arith.constant 0 : i32
    %34 = tpu.memref_slice %arg1[%c0_i32_36, %c0_i32_37, %c0_i32_38] : memref<1x168x128xbf16, #tpu.memory_space<vmem>> -> memref<1x168x128xbf16, #tpu.memory_space<vmem>>
    %35 = tpu.memref_squeeze %34 : memref<1x168x128xbf16, #tpu.memory_space<vmem>> -> memref<168x128xbf16, #tpu.memory_space<vmem>>
    %c18 = arith.constant 18 : index
    %c0_39 = arith.constant 0 : index
    %36 = vector.load %35[%c18, %c0_39] : memref<168x128xbf16, #tpu.memory_space<vmem>>, vector<128x128xbf16>
    %c5 = arith.constant 5 : index
    %c0_40 = arith.constant 0 : index
    %c0_41 = arith.constant 0 : index
    %37 = vector.load %arg2[%c5, %c0_40, %c0_41] : memref<9x128x64xbf16, #tpu.memory_space<vmem>>, vector<1x128x64xbf16>
    %38 = vector.shape_cast %37 : vector<1x128x64xbf16> to vector<128x64xbf16>
    %cst_42 = arith.constant dense<0.000000e+00> : vector<128x64xf32>
    %39 = tpu.matmul %36, %38, %cst_42 {dimension_numbers = #tpu.dot_dimension_numbers<[1], [0], [0], [1], [0, 0, 1, 1], [], []>} : vector<128x128xbf16>, vector<128x64xbf16>, vector<128x64xf32> -> vector<128x64xf32>
    %40 = arith.addf %33, %39 : vector<128x64xf32>
    %c0_i32_43 = arith.constant 0 : i32
    %c0_i32_44 = arith.constant 0 : i32
    %c0_i32_45 = arith.constant 0 : i32
    %41 = tpu.memref_slice %arg1[%c0_i32_43, %c0_i32_44, %c0_i32_45] : memref<1x168x128xbf16, #tpu.memory_space<vmem>> -> memref<1x168x128xbf16, #tpu.memory_space<vmem>>
    %42 = tpu.memref_squeeze %41 : memref<1x168x128xbf16, #tpu.memory_space<vmem>> -> memref<168x128xbf16, #tpu.memory_space<vmem>>
    %c32 = arith.constant 32 : index
    %c0_46 = arith.constant 0 : index
    %43 = vector.load %42[%c32, %c0_46] : memref<168x128xbf16, #tpu.memory_space<vmem>>, vector<128x128xbf16>
    %c6 = arith.constant 6 : index
    %c0_47 = arith.constant 0 : index
    %c0_48 = arith.constant 0 : index
    %44 = vector.load %arg2[%c6, %c0_47, %c0_48] : memref<9x128x64xbf16, #tpu.memory_space<vmem>>, vector<1x128x64xbf16>
    %45 = vector.shape_cast %44 : vector<1x128x64xbf16> to vector<128x64xbf16>
    %cst_49 = arith.constant dense<0.000000e+00> : vector<128x64xf32>
    %46 = tpu.matmul %43, %45, %cst_49 {dimension_numbers = #tpu.dot_dimension_numbers<[1], [0], [0], [1], [0, 0, 1, 1], [], []>} : vector<128x128xbf16>, vector<128x64xbf16>, vector<128x64xf32> -> vector<128x64xf32>
    %47 = arith.addf %40, %46 : vector<128x64xf32>
    %c0_i32_50 = arith.constant 0 : i32
    %c0_i32_51 = arith.constant 0 : i32
    %c0_i32_52 = arith.constant 0 : i32
    %48 = tpu.memref_slice %arg1[%c0_i32_50, %c0_i32_51, %c0_i32_52] : memref<1x168x128xbf16, #tpu.memory_space<vmem>> -> memref<1x168x128xbf16, #tpu.memory_space<vmem>>
    %49 = tpu.memref_squeeze %48 : memref<1x168x128xbf16, #tpu.memory_space<vmem>> -> memref<168x128xbf16, #tpu.memory_space<vmem>>
    %c33 = arith.constant 33 : index
    %c0_53 = arith.constant 0 : index
    %50 = vector.load %49[%c33, %c0_53] : memref<168x128xbf16, #tpu.memory_space<vmem>>, vector<128x128xbf16>
    %c7 = arith.constant 7 : index
    %c0_54 = arith.constant 0 : index
    %c0_55 = arith.constant 0 : index
    %51 = vector.load %arg2[%c7, %c0_54, %c0_55] : memref<9x128x64xbf16, #tpu.memory_space<vmem>>, vector<1x128x64xbf16>
    %52 = vector.shape_cast %51 : vector<1x128x64xbf16> to vector<128x64xbf16>
    %cst_56 = arith.constant dense<0.000000e+00> : vector<128x64xf32>
    %53 = tpu.matmul %50, %52, %cst_56 {dimension_numbers = #tpu.dot_dimension_numbers<[1], [0], [0], [1], [0, 0, 1, 1], [], []>} : vector<128x128xbf16>, vector<128x64xbf16>, vector<128x64xf32> -> vector<128x64xf32>
    %54 = arith.addf %47, %53 : vector<128x64xf32>
    %c0_i32_57 = arith.constant 0 : i32
    %c0_i32_58 = arith.constant 0 : i32
    %c0_i32_59 = arith.constant 0 : i32
    %55 = tpu.memref_slice %arg1[%c0_i32_57, %c0_i32_58, %c0_i32_59] : memref<1x168x128xbf16, #tpu.memory_space<vmem>> -> memref<1x168x128xbf16, #tpu.memory_space<vmem>>
    %56 = tpu.memref_squeeze %55 : memref<1x168x128xbf16, #tpu.memory_space<vmem>> -> memref<168x128xbf16, #tpu.memory_space<vmem>>
    %c34 = arith.constant 34 : index
    %c0_60 = arith.constant 0 : index
    %57 = vector.load %56[%c34, %c0_60] : memref<168x128xbf16, #tpu.memory_space<vmem>>, vector<128x128xbf16>
    %c8 = arith.constant 8 : index
    %c0_61 = arith.constant 0 : index
    %c0_62 = arith.constant 0 : index
    %58 = vector.load %arg2[%c8, %c0_61, %c0_62] : memref<9x128x64xbf16, #tpu.memory_space<vmem>>, vector<1x128x64xbf16>
    %59 = vector.shape_cast %58 : vector<1x128x64xbf16> to vector<128x64xbf16>
    %cst_63 = arith.constant dense<0.000000e+00> : vector<128x64xf32>
    %60 = tpu.matmul %57, %59, %cst_63 {dimension_numbers = #tpu.dot_dimension_numbers<[1], [0], [0], [1], [0, 0, 1, 1], [], []>} : vector<128x128xbf16>, vector<128x64xbf16>, vector<128x64xf32> -> vector<128x64xf32>
    %61 = arith.addf %54, %60 : vector<128x64xf32>
    %c0_64 = arith.constant 0 : index
    %c0_65 = arith.constant 0 : index
    %62 = vector.load %arg3[%c0_64, %c0_65] : memref<1x64xf32, #tpu.memory_space<vmem>>, vector<1x64xf32>
    %63 = vector.broadcast %62 : vector<1x64xf32> to vector<128x64xf32>
    %64 = arith.addf %61, %63 : vector<128x64xf32>
    %65 = tpu.iota {dimensions = array<i32: 0>} : vector<128x1xi32>
    %c0_i32_66 = arith.constant 0 : i32
    %66 = vector.broadcast %c0_i32_66 : i32 to vector<128x1xi32>
    %67 = arith.addi %66, %65 : vector<128x1xi32>
    %c128_i32 = arith.constant 128 : i32
    %68 = vector.broadcast %c128_i32 : i32 to vector<128x1xi32>
    %69 = arith.cmpi slt, %67, %68 : vector<128x1xi32>
    %c16_i32 = arith.constant 16 : i32
    %70 = vector.broadcast %c16_i32 : i32 to vector<128x1xi32>
    %71 = arith.remsi %67, %70 : vector<128x1xi32>
    %c8_i32 = arith.constant 8 : i32
    %72 = vector.broadcast %c8_i32 : i32 to vector<128x1xi32>
    %73 = arith.cmpi slt, %71, %72 : vector<128x1xi32>
    %74 = arith.andi %69, %73 : vector<128x1xi1>
    %cst_67 = arith.constant 0.000000e+00 : f32
    %75 = vector.shape_cast %74 : vector<128x1xi1> to vector<128x1xi1>
    %76 = vector.broadcast %75 : vector<128x1xi1> to vector<128x64xi1>
    %77 = vector.broadcast %cst_67 : f32 to vector<128x64xf32>
    %78 = arith.select %76, %64, %77 : vector<128x64xi1>, vector<128x64xf32>
    %cst_68 = arith.constant dense<0.000000e+00> : vector<64xf32>
    %79 = vector.multi_reduction <add>, %78, %cst_68 [0] : vector<128x64xf32> to vector<64xf32>
    %80 = vector.shape_cast %79 : vector<64xf32> to vector<1x64xf32>
    %81 = arith.mulf %78, %78 : vector<128x64xf32>
    %cst_69 = arith.constant dense<0.000000e+00> : vector<64xf32>
    %82 = vector.multi_reduction <add>, %81, %cst_69 [0] : vector<128x64xf32> to vector<64xf32>
    %83 = vector.shape_cast %82 : vector<64xf32> to vector<1x64xf32>
    %cst_70 = arith.constant 1.562500e-02 : f32
    %84 = vector.broadcast %cst_70 : f32 to vector<1x64xf32>
    %85 = arith.mulf %80, %84 : vector<1x64xf32>
    %cst_71 = arith.constant 1.562500e-02 : f32
    %86 = vector.broadcast %cst_71 : f32 to vector<1x64xf32>
    %87 = arith.mulf %83, %86 : vector<1x64xf32>
    %88 = arith.mulf %85, %85 : vector<1x64xf32>
    %89 = arith.subf %87, %88 : vector<1x64xf32>
    %cst_72 = arith.constant 0.000000e+00 : f32
    %90 = vector.broadcast %cst_72 : f32 to vector<1x64xf32>
    %91 = arith.maximumf %89, %90 : vector<1x64xf32>
    %92 = vector.broadcast %85 : vector<1x64xf32> to vector<128x64xf32>
    %93 = arith.subf %64, %92 : vector<128x64xf32>
    %cst_73 = arith.constant 9.99999974E-6 : f32
    %94 = vector.broadcast %cst_73 : f32 to vector<1x64xf32>
    %95 = arith.addf %91, %94 : vector<1x64xf32>
    %96 = math.rsqrt %95 : vector<1x64xf32>
    %97 = vector.broadcast %96 : vector<1x64xf32> to vector<128x64xf32>
    %98 = arith.mulf %93, %97 : vector<128x64xf32>
    %cst_74 = arith.constant 0.000000e+00 : f32
    %99 = vector.broadcast %cst_74 : f32 to vector<128x64xf32>
    %100 = arith.maximumf %98, %99 : vector<128x64xf32>
    %101 = arith.truncf %100 : vector<128x64xf32> to vector<128x64xbf16>
    %c0_75 = arith.constant 0 : index
    %c0_76 = arith.constant 0 : index
    %c0_77 = arith.constant 0 : index
    %102 = vector.load %arg4[%c0_75, %c0_76, %c0_77] : memref<1x128x64xbf16, #tpu.memory_space<vmem>>, vector<1x128x64xbf16>
    %103 = vector.shape_cast %102 : vector<1x128x64xbf16> to vector<128x64xbf16>
    %104 = vector.shape_cast %101 : vector<128x64xbf16> to vector<1x128x64xbf16>
    tpu.vector_store %arg4[%c0_75, %c0_76, %c0_77], %104 {strides = array<i32>} : memref<1x128x64xbf16, #tpu.memory_space<vmem>>, vector<1x128x64xbf16>,
    return
  }
  func.func @transform_0(%arg0: i32) -> (i32, i32, i32) {
    %c0_i32 = arith.constant 0 : i32
    %c0_i32_0 = arith.constant 0 : i32
    %c0_i32_1 = arith.constant 0 : i32
    return %arg0, %c0_i32, %c0_i32_0 : i32, i32, i32
  }
  func.func @transform_1(%arg0: i32) -> (i32, i32, i32) {
    %c0_i32 = arith.constant 0 : i32
    %c0_i32_0 = arith.constant 0 : i32
    %c0_i32_1 = arith.constant 0 : i32
    %c0_i32_2 = arith.constant 0 : i32
    return %c0_i32, %c0_i32_0, %c0_i32_1 : i32, i32, i32
  }
  func.func @transform_2(%arg0: i32) -> (i32, i32) {
    %c0_i32 = arith.constant 0 : i32
    %c0_i32_0 = arith.constant 0 : i32
    %c0_i32_1 = arith.constant 0 : i32
    return %c0_i32, %c0_i32_0 : i32, i32
  }
  func.func @transform_3(%arg0: i32) -> (i32, i32, i32) {
    %c0_i32 = arith.constant 0 : i32
    %c0_i32_0 = arith.constant 0 : i32
    %c0_i32_1 = arith.constant 0 : i32
    return %arg0, %c0_i32, %c0_i32_0 : i32, i32, i32
  }
}

</mosaic_0001>

<bundles_post_ra>
// kernel: _lambda_.1
= control target key start
LH: loop header
LB: loop body
LE: loop exit
PB: predicated region body
PF: predicated region fallthrough
CT: control target
= control target key end

     0   :  { %s3200_s12 = smov 0   ;;  %s3882_s0 = inlined_call_operand.vmem [shape: bf16[2,168,128], index: 0, kind: input, shape index: {}]   ;;  %s3883_s1 = inlined_call_operand.vmem [shape: bf16[9,128,64], index: 1, kind: input, shape index: {}]   ;;  %s3884_s2 = inlined_call_operand.vmem [shape: f32[1,64], index: 2, kind: input, shape index: {}]   ;;  %s3885_s3 = inlined_call_operand.vmem [shape: bf16[2,128,64], index: 3, kind: output, shape index: {}]  }
   0x1 LB: > { %s2429_s13 = sadd.s32 4294967295, %s3178_s12   ;;  %p2433_p0 = scmp.ge.s32.totalorder %s3178_s12, 1  ;;  %s3178_s12 = sphi %s3200_s12, %s13_s12  }
   0x2   : > { %p137_p1 = scmp.lt.s32.totalorder %s3178_s12, 3 }
   0x4   : > { %p138_p2 = pnand %p2433_p0, %p137_p1 }
   0x5   : > { %p161_p3 = scmp.lt.s32.totalorder (!%p138_p2), %s2429_s13, 1 }
   0x6   : > { %141 = sbr.rel (%p138_p2) target bundleno = 521 (0x209), region = 32 }
   0xb   : > { %v3026_v0 = vld [vmem:[%s3883_s1 + $0x78] sm:$0xff]  ;;  %v3025_v1 = vld [vmem:[%s3883_s1 + $0x70] sm:$0xff]  ;;  %s3887_s13 = smov (!%p161_p3, %s2429_s13), 1  ;;  %v3024_v2 = vld [vmem:[%s3883_s1 + $0x68] sm:$0xff]  ;;  %vm264_vm0 = vsmask.f32 7424 }
   0xc   : > { %3136 = vmatpush.bf16.msra.mxu1 %v3026_v0  ;;  %3137 = vmatpush.bf16.msra.mxu2 %v3026_v0  ;;  %s3160_s20 = smul.u32 84, %s3887_s13  ;;  %v3023_v3 = vld [vmem:[%s3883_s1 + $0x60] sm:$0xff]  ;;  %v3022_v4 = vld [vmem:[%s3883_s1 + $0x58] sm:$0xff]  ;;  %v3021_v11 = vld [vmem:[%s3883_s1 + $0x50] sm:$0xff]  ;;  %vm564_vm1 = vcmask 1046528   ;;  %vm2186_vm2 = vcmask 523264  }
   0xd   : > { %3138 = vmatpush.bf16.msra.mxu3 %v3026_v0  ;;  %389 = vmatpush.bf16.msra.mxu0 %v3026_v0  ;;  %v3020_v22 = vld [vmem:[%s3883_s1 + $0x48] sm:$0xff]  ;;  %v3019_v31 = vld [vmem:[%s3883_s1 + $0x40] sm:$0xff]  ;;  %v3034_v40 = vld [vmem:[%s3883_s1 + $0xb8] sm:$0xff]  ;;  %s3003_s18 = sshll.u32 %s3887_s13, 6  ;;  %vm2357_vm6 = vcmask 519168  }
   0xe   : > { %s3226_s25 = scalar_lea.vmem %s3882_s0, %s3160_s20  ;;  %v3018_v41 = vld [vmem:[%s3883_s1 + $0x38] sm:$0xff]  ;;  %v3033_v50 = vld [vmem:[%s3883_s1 + $0xb0] sm:$0xff]  ;;  %v3032_v55 = vld [vmem:[%s3883_s1 + $0xa8] sm:$0xff]  ;;  %s3845_s21 = scalar_lea.vmem %s3885_s3, %s3003_s18 }
   0xf   : > { %v3232_v5 = vld [vmem:[%s3226_s25 + $0x10] sm:$0xff]  ;;  %v3235_v6 = vld [vmem:[%s3226_s25 + $0x20] sm:$0xff]  ;;  %v3244_v9 = vld [vmem:[%s3226_s25 + $0x18] sm:$0xff] }
  0x10   : > { %3139 = vmatpush.bf16.msra.mxu1 %v3025_v1  ;;  %3140 = vmatpush.bf16.msra.mxu2 %v3025_v1  ;;  %v3238_v7 = vld [vmem:[%s3226_s25 + $0x30] sm:$0xff]  ;;  %v3241_v8 = vld [vmem:[%s3226_s25] sm:$0xff]   ;;  %v3247_v10 = vld [vmem:[%s3226_s25 + $0x28] sm:$0xff]  ;;  %v281_v12 = vshll.u32 %v3232_v5, 16  ;;  %v297_v13 = vshll.u32 %v3235_v6, 16  ;;  %v285_v18 = vshrl.u32 %v3232_v5, 16 }
  0x11   : > { %3141 = vmatpush.bf16.msra.mxu3 %v3025_v1  ;;  %390 = vmatpush.bf16.msra.mxu0 %v3025_v1  ;;  %v3255_v14 = vld [vmem:[%s3226_s25 + $0x38] sm:$0xff]  ;;  %v313_v15 = vshll.u32 %v3238_v7, 16  ;;  %v3259_v16 = vld [vmem:[%s3226_s25 + $0x8] sm:$0xff]  ;;  %v268_v17 = vshll.u32 %v3241_v8, 16  ;;  %v289_v19 = vshll.u32 %v3244_v9, 16  ;;  %v301_v20 = vshrl.u32 %v3235_v6, 16 }
  0x12   : > { %v305_v21 = vshll.u32 %v3247_v10, 16  ;;  %v3269_v23 = vrot.slane %v281_v12, 1  ;;  %v3271_v24 = vrot.slane %v297_v13, 1  ;;  %v317_v25 = vshrl.u32 %v3238_v7, 16  ;;  %v203_v42 = vld [vmem:[%s3226_s25 + $0x40] sm:$0x1] }
  0x13   : > { %v321_v26 = vshll.u32 %v3255_v14, 16  ;;  %v3275_v27 = vrot.slane %v313_v15, 1  ;;  %v266_v28 = vshrl.u32 %v3241_v8, 16  ;;  %v270_v29 = vrot.slane %v268_v17, 1  ;;  %v3050_v46 = vld [vmem:[%s3883_s1 + $0xf8] sm:$0xff]  ;;  %v3017_v51 = vld [vmem:[%s3883_s1 + $0x30] sm:$0xff] }
  0x14   : > { %3142 = vmatpush.bf16.msra.mxu1 %v3024_v2  ;;  %3143 = vmatpush.bf16.msra.mxu2 %v3024_v2  ;;  %v273_v30 = vshll.u32 %v3259_v16, 16  ;;  %v287_v32 = vor.u32 %v285_v18, %v3269_v23  ;;  %v291_v33 = vrot.slane %v289_v19, 1  ;;  %v303_v34 = vor.u32 %v301_v20, %v3271_v24  ;;  %v3065_v48 = vld [vmem:[%s3883_s1 + $0x138] sm:$0xff]  ;;  %v3049_v52 = vld [vmem:[%s3883_s1 + $0xf0] sm:$0xff]  ;;  %v3016_v56 = vld [vmem:[%s3883_s1 + $0x28] sm:$0xff] }
  0x15   : > { %3144 = vmatpush.bf16.msra.mxu3 %v3024_v2  ;;  %391 = vmatpush.bf16.msra.mxu0 %v3024_v2  ;;  %v307_v35 = vrot.slane %v305_v21, 1  ;;  %v319_v36 = vor.u32 %v317_v25, %v3275_v27  ;;  %v323_v37 = vrot.slane %v321_v26, 1  ;;  %v271_v38 = vor.u32 %v270_v29, %v266_v28  ;;  %v3064_v53 = vld [vmem:[%s3883_s1 + $0x130] sm:$0xff]  ;;  %v3048_v59 = vld [vmem:[%s3883_s1 + $0xe8] sm:$0xff]  ;;  %v3031_v0 = vld [vmem:[%s3883_s1 + $0xa0] sm:$0xff] }
  0x16   : > { %v275_v39 = vrot.slane %v273_v30, 1  ;;  %v292_v43 = vsel %vm264_vm0, %v287_v32, %v291_v33  ;;  %v254_v49 = vunpack.c.l.b16 %v203_v42  ;;  %v293_v57 = vshrl.u32 %v3244_v9, 16  ;;  %v3063_v60 = vld [vmem:[%s3883_s1 + $0x128] sm:$0xff]  ;;  %v3015_v1 = vld [vmem:[%s3883_s1 + $0x20] sm:$0xff]  ;;  %v3030_v17 = vld [vmem:[%s3883_s1 + $0x98] sm:$0xff] }
  0x17   : > { %v308_v44 = vsel %vm264_vm0, %v303_v34, %v307_v35  ;;  %v324_v45 = vsel %vm264_vm0, %v319_v36, %v323_v37  ;;  %v309_v58 = vshrl.u32 %v3247_v10, 16  ;;  %v325_v61 = vshrl.u32 %v3255_v14, 16  ;;  %v3014_v18 = vld [vmem:[%s3883_s1 + $0x18] sm:$0xff]  ;;  %v3029_v26 = vld [vmem:[%s3883_s1 + $0x90] sm:$0xff]  ;;  %v3128_v28 = vld [vmem:[%s3226_s25 + $0x8] sm:$0xff]  }
  0x18   : > { %3145 = vmatpush.bf16.msra.mxu1 %v3023_v3  ;;  %3146 = vmatpush.bf16.msra.mxu2 %v3023_v3  ;;  %v276_v47 = vsel %vm264_vm0, %v271_v38, %v275_v39  ;;  %v3314_v54 = vpack.c.b16 %v254_v49, %v254_v49  ;;  %v277_v63 = vshrl.u32 %v3259_v16, 16  ;;  %v295_v2 = vor.u32 %v293_v57, %v291_v33  ;;  %v3060_v29 = vld [vmem:[%s3883_s1 + $0x110] sm:$0xff]  ;;  %v3125_v30 = vld [vmem:[%s3226_s25] sm:$0xf0]  ;;  %v3028_v34 = vld [vmem:[%s3883_s1 + $0x88] sm:$0xff] }
  0x19   : > { %3147 = vmatpush.bf16.msra.mxu3 %v3023_v3  ;;  %392 = vmatpush.bf16.msra.mxu0 %v3023_v3  ;;  %v311_v3 = vor.u32 %v309_v58, %v307_v35  ;;  %v327_v12 = vor.u32 %v325_v61, %v323_v37  ;;  %v3380_v32 = vld [vmem:[%s3226_s25 + $0x10] sm:$0xff]  ;;  %v977_v33 = vshll.u32 %v3128_v28, 16  ;;  %v3012_v35 = vld [vmem:[%s3883_s1 + $0x8] sm:$0xff]  ;;  %v3027_v42 = vld [vmem:[%s3883_s1 + $0x80] sm:$0xff] }
  0x1a   : > { %v329_v62 = vshll.u32 %v3314_v54, 16  ;;  %v279_v15 = vor.u32 %v277_v63, %v275_v39  ;;  %v300_v19 = vsel %vm264_vm0, %v295_v2, %v3271_v24  ;;  %v3061_v24 = vld [vmem:[%s3883_s1 + $0x118] sm:$0xff]  ;;  %v3044_v37 = vld [vmem:[%s3883_s1 + $0xc8] sm:$0xff]  ;;  %v975_v39 = vshrl.u32 %v3128_v28, 16  ;;  %v3058_v49 = vld [vmem:[%s3883_s1 + $0x100] sm:$0xff] }
  0x1b   : > { %v316_v20 = vsel %vm264_vm0, %v311_v3, %v3275_v27  ;;  %v3013_v27 = vld [vmem:[%s3883_s1 + $0x10] sm:$0xff]  ;;  %v3059_v38 = vld [vmem:[%s3883_s1 + $0x108] sm:$0xff]  ;;  %v986_v2 = vshrl.u32 %v3380_v32, 16 }
  0x1c   : > { %3148 = vmatpush.bf16.msra.mxu1 %v3022_v4  ;;  %3149 = vmatpush.bf16.msra.mxu2 %v3022_v4  ;;  %v331_v13 = vrot.slane %v329_v62, 1  ;;  %v284_v25 = vsel %vm264_vm0, %v279_v15, %v3269_v23  ;;  %v3045_v23 = vld [vmem:[%s3883_s1 + $0xd0] sm:$0xff]  ;;  %v3437_v62 = vld [vmem:[%s3226_s25 + $0x18] sm:$0xff]  ;;  %v3087_v63 = vld [vmem:[%s3883_s1 + $0x1a8] sm:$0xff] }
  0x1d   : > { %3150 = vmatpush.bf16.msra.mxu3 %v3022_v4  ;;  %393 = vmatpush.bf16.msra.mxu0 %v3022_v4  ;;  %v3047_v4 = vld [vmem:[%s3883_s1 + $0xe0] sm:$0xff]  ;;  %v3088_v58 = vld [vmem:[%s3883_s1 + $0x1b0] sm:$0xff]  ;;  %v990_v3 = vshll.u32 %v3437_v62, 16 }
  0x1e   : > { %v332_v21 = vsel %vm264_vm0, %v327_v12, %v331_v13  ;;  %v3111_v61 = vld [vmem:[%s3883_s1 + $0x230] sm:$0xff] }
  0x1f   : > { %v992_v12 = vrot.slane %v990_v3, 1  ;;  %v3036_v15 = vld [vmem:[%s3226_s25 + $0x10] sm:$0xff] }
  0x20   : > { %3151 = vmatpush.bf16.msra.mxu1 %v3021_v11  ;;  %3152 = vmatpush.bf16.msra.mxu2 %v3021_v11 }
  0x21   : > { %3153 = vmatpush.bf16.msra.mxu3 %v3021_v11  ;;  %394 = vmatpush.bf16.msra.mxu0 %v3021_v11  ;;  %v3062_v11 = vld [vmem:[%s3883_s1 + $0x120] sm:$0xff] }
  0x24   : > { %3154 = vmatpush.bf16.msra.mxu1 %v3020_v22  ;;  %3155 = vmatpush.bf16.msra.mxu2 %v3020_v22 }
  0x25   : > { %3156 = vmatpush.bf16.msra.mxu3 %v3020_v22  ;;  %395 = vmatpush.bf16.msra.mxu0 %v3020_v22  ;;  %v3046_v22 = vld [vmem:[%s3883_s1 + $0xd8] sm:$0xff] }
  0x28   : > { %3157 = vmatpush.bf16.msra.mxu1 %v3019_v31  ;;  %3158 = vmatpush.bf16.msra.mxu2 %v3019_v31 }
  0x29   : > { %3159 = vmatpush.bf16.msra.mxu3 %v3019_v31  ;;  %396 = vmatpush.bf16.msra.mxu0 %v3019_v31  ;;  %v3126_v31 = vld [vmem:[%s3226_s25] sm:$0xe] }
  0x2a   : > { %v3127_v36 = vor.u32 %v3126_v31, %v3125_v30  ;;  %v3085_v30 = vld [vmem:[%s3883_s1 + $0x198] sm:$0xff] }
  0x2b   : > { %407 = vmatmul.bf16.vlgmr.msra.gmra.mxu1 %v292_v43  ;;  %417 = vmatmul.bf16.vlgmr.msra.gmra.mxu2 %v308_v44  ;;  %v3011_v43 = vld [vmem:[%s3883_s1] sm:$0xff]  ;;  %v3089_v44 = vld [vmem:[%s3883_s1 + $0x1b8] sm:$0xff] }
  0x2c   : > { %638 = vmatpush.bf16.msrb.mxu2 %v3034_v40  ;;  %494 = vmatpush.bf16.msrb.mxu1 %v3018_v41  ;;  %v979_v40 = vrot.slane %v977_v33, 1  ;;  %v982_v41 = vshll.u32 %v3380_v32, 16  ;;  %v3100_v31 = vld [vmem:[%s3883_s1 + $0x1d8] sm:$0xff] }
  0x2d   : > { %427 = vmatmul.bf16.vlgmr.msra.gmra.mxu3 %v324_v45  ;;  %397 = vmatmul.bf16.vlgmr.msra.gmra.mxu0 %v276_v47  ;;  %v3073_v45 = vld [vmem:[%s3883_s1 + $0x178] sm:$0xff]  ;;  %v566_v47 = vrot.slane %v3259_v16, 1 }
  0x2e   : > { %832 = vmatpush.bf16.msrb.mxu3 %v3050_v46  ;;  %1098 = vmatpush.bf16.msrb.mxu0 %v3065_v48  ;;  %v565_v46 = vrot.slane %v3127_v36, 1  ;;  %v3043_v48 = vld [vmem:[%s3883_s1 + $0xc0] sm:$0xff]  ;;  %v3069_v33 = vld [vmem:[%s3883_s1 + $0x158] sm:$0xff] }
  0x30   : > { %639 = vmatpush.bf16.msrb.mxu2 %v3033_v50  ;;  %495 = vmatpush.bf16.msrb.mxu1 %v3017_v51  ;;  %v980_v50 = vor.u32 %v979_v40, %v975_v39  ;;  %v984_v51 = vrot.slane %v982_v41, 1  ;;  %v3038_v41 = vld [vmem:[%s3226_s25 + $0x20] sm:$0xff] }
  0x32   : > { %833 = vmatpush.bf16.msrb.mxu3 %v3049_v52  ;;  %1099 = vmatpush.bf16.msrb.mxu0 %v3064_v53  ;;  %v3104_v52 = vld [vmem:[%s3883_s1 + $0x1f8] sm:$0xff]  ;;  %v985_v57 = vsel %vm264_vm0, %v980_v50, %v984_v51 }
  0x33   : > { %v3112_v53 = vld [vmem:[%s3883_s1 + $0x238] sm:$0xff] }
  0x34   : > { %640 = vmatpush.bf16.msrb.mxu2 %v3032_v55  ;;  %496 = vmatpush.bf16.msrb.mxu1 %v3016_v56  ;;  %v567_v55 = vsel %vm564_vm1, %v565_v46, %v566_v47  ;;  %v3035_v56 = vld [vmem:[%s3226_s25 + $0x8] sm:$0xff]  ;;  %v3512_v46 = vld [vmem:[%s3226_s25 + $0x30] sm:$0xff] }
  0x36   : > { %834 = vmatpush.bf16.msrb.mxu3 %v3048_v59  ;;  %1100 = vmatpush.bf16.msrb.mxu0 %v3063_v60  ;;  %v3072_v59 = vld [vmem:[%s3883_s1 + $0x170] sm:$0xff] }
  0x37   : > { %v3103_v60 = vld [vmem:[%s3883_s1 + $0x1f0] sm:$0xff] }
  0x38   : > { %641 = vmatpush.bf16.msrb.mxu2 %v3031_v0  ;;  %497 = vmatpush.bf16.msrb.mxu1 %v3015_v1  ;;  %v3071_v0 = vld [vmem:[%s3883_s1 + $0x168] sm:$0xff] }
  0x39   : > { %v3110_v1 = vld [vmem:[%s3883_s1 + $0x228] sm:$0xff] }
  0x3a   : > { %835 = vmatpush.bf16.msrb.mxu3 %v3047_v4  ;;  %1101 = vmatpush.bf16.msrb.mxu0 %v3062_v11  ;;  %v568_v4 = vrot.slane %v3232_v5, 1  ;;  %v988_v11 = vor.u32 %v986_v2, %v984_v51  ;;  %v3040_v2 = vld [vmem:[%s3226_s25 + $0x30] sm:$0xff] }
  0x3b   : > { %412 = vmatmul.bf16.gmra.mxu1 %v300_v19  ;;  %422 = vmatmul.bf16.gmra.mxu2 %v316_v20  ;;  %v3101_v19 = vld [vmem:[%s3883_s1 + $0x1e0] sm:$0xff] }
  0x3c   : > { %642 = vmatpush.bf16.msrb.mxu2 %v3030_v17  ;;  %498 = vmatpush.bf16.msrb.mxu1 %v3014_v18  ;;  %v569_v13 = vsel %vm564_vm1, %v566_v47, %v568_v4  ;;  %v993_v17 = vsel %vm264_vm0, %v988_v11, %v992_v12  ;;  %v3086_v18 = vld [vmem:[%s3883_s1 + $0x1a0] sm:$0xff] }
  0x3d   : > { %432 = vmatmul.bf16.gmra.mxu3 %v332_v21  ;;  %402 = vmatmul.bf16.gmra.mxu0 %v284_v25  ;;  %v3070_v20 = vld [vmem:[%s3883_s1 + $0x160] sm:$0xff] }
  0x3e   : > { %836 = vmatpush.bf16.msrb.mxu3 %v3046_v22  ;;  %1102 = vmatpush.bf16.msrb.mxu0 %v3061_v24  ;;  %v3468_v21 = vld [vmem:[%s3226_s25 + $0x20] sm:$0xff]  ;;  %v994_v22 = vshrl.u32 %v3437_v62, 16  ;;  %v570_v24 = vrot.slane %v3244_v9, 1 }
  0x3f   : > { %v998_v25 = vshll.u32 %v3468_v21, 16  ;;  %v3097_v11 = vld [vmem:[%s3883_s1 + $0x1c0] sm:$0xff] }
  0x40   : > { %643 = vmatpush.bf16.msrb.mxu2 %v3029_v26  ;;  %499 = vmatpush.bf16.msrb.mxu1 %v3013_v27  ;;  %v996_v26 = vor.u32 %v994_v22, %v992_v12  ;;  %v571_v28 = vsel %vm564_vm1, %v568_v4, %v570_v24  ;;  %v3082_v4 = vld [vmem:[%s3883_s1 + $0x180] sm:$0xff] }
  0x41   : > { %v1000_v27 = vrot.slane %v998_v25, 1  ;;  %v3553_v12 = vld [vmem:[%s3226_s25 + $0x40] sm:$0xff] }
  0x42   : > { %837 = vmatpush.bf16.msrb.mxu3 %v3045_v23  ;;  %1103 = vmatpush.bf16.msrb.mxu0 %v3060_v29  ;;  %v3037_v23 = vld [vmem:[%s3226_s25 + $0x18] sm:$0xff] }
  0x43   : > { %v1001_v29 = vsel %vm264_vm0, %v996_v26, %v1000_v27 }
  0x44   : > { %644 = vmatpush.bf16.msrb.mxu2 %v3028_v34  ;;  %500 = vmatpush.bf16.msrb.mxu1 %v3012_v35  ;;  %v3490_v34 = vld [vmem:[%s3226_s25 + $0x28] sm:$0xff]  ;;  %v1002_v35 = vshrl.u32 %v3468_v21, 16 }
  0x45   : > { %v1006_v36 = vshll.u32 %v3490_v34, 16  ;;  %v1010_v47 = vshrl.u32 %v3490_v34, 16 }
  0x46   : > { %838 = vmatpush.bf16.msrb.mxu3 %v3044_v37  ;;  %1104 = vmatpush.bf16.msrb.mxu0 %v3059_v38  ;;  %v572_v37 = vrot.slane %v3235_v6, 1  ;;  %v1004_v38 = vor.u32 %v1002_v35, %v1000_v27 }
  0x47   : > { %v1008_v39 = vrot.slane %v1006_v36, 1 }
  0x48   : > { %645 = vmatpush.bf16.msrb.mxu2 %v3027_v42  ;;  %501 = vmatpush.bf16.msrb.mxu1 %v3011_v43  ;;  %v573_v40 = vsel %vm564_vm1, %v570_v24, %v572_v37  ;;  %v3084_v43 = vld [vmem:[%s3883_s1 + $0x190] sm:$0xff]  ;;  %v3041_v24 = vld [vmem:[%s3226_s25 + $0x38] sm:$0xff] }
  0x49   : > { %v1009_v42 = vsel %vm264_vm0, %v1004_v38, %v1008_v39  ;;  %v1012_v50 = vor.u32 %v1010_v47, %v1008_v39  ;;  %v3090_v47 = vld [vmem:[%s3226_s25 + $0x18] sm:$0xff] }
  0x4a   : > { %839 = vmatpush.bf16.msrb.mxu3 %v3043_v48  ;;  %1105 = vmatpush.bf16.msrb.mxu0 %v3058_v49  ;;  %v1014_v48 = vshll.u32 %v3512_v46, 16  ;;  %v574_v49 = vrot.slane %v3247_v10, 1 }
  0x4b   : > { %502 = vmatmul.bf16.vlgmr.msrb.gmra.mxu1 %v3241_v8  ;;  %646 = vmatmul.bf16.vlgmr.msrb.gmra.mxu2 %v567_v55  ;;  %v3102_v8 = vld [vmem:[%s3883_s1 + $0x1e8] sm:$0xff] }
  0x4c   : > { %1451 = vmatpush.bf16.msra.mxu2 %v3089_v44  ;;  %1257 = vmatpush.bf16.msra.mxu1 %v3073_v45  ;;  %v3099_v44 = vld [vmem:[%s3883_s1 + $0x1d0] sm:$0xff]  ;;  %v1016_v51 = vrot.slane %v1014_v48, 1 }
  0x4d   : > { %840 = vmatmul.bf16.vlgmr.msrb.gmra.mxu3 %v3035_v56  ;;  %1106 = vmatmul.bf16.vlgmr.msrb.gmra.mxu0 %v985_v57  ;;  %v3068_v45 = vld [vmem:[%s3883_s1 + $0x150] sm:$0xff]  ;;  %v3083_v56 = vld [vmem:[%s3883_s1 + $0x188] sm:$0xff] }
  0x4e   : > { %1717 = vmatpush.bf16.msra.mxu3 %v3104_v52  ;;  %1876 = vmatpush.bf16.msra.mxu0 %v3112_v53  ;;  %v575_v52 = vsel %vm564_vm1, %v572_v37, %v574_v49  ;;  %v3039_v53 = vld [vmem:[%s3226_s25 + $0x28] sm:$0xff]  ;;  %v1017_v55 = vsel %vm264_vm0, %v1012_v50, %v1016_v51  ;;  %v3133_v50 = vld [vmem:[%s3226_s25 + $0x10] sm:$0xf0] }
  0x4f   : > { %v3098_v57 = vld [vmem:[%s3883_s1 + $0x1c8] sm:$0xff] }
  0x50   : > { %1452 = vmatpush.bf16.msra.mxu2 %v3088_v58  ;;  %1258 = vmatpush.bf16.msra.mxu1 %v3072_v59  ;;  %v3531_v58 = vld [vmem:[%s3226_s25 + $0x38] sm:$0xff]  ;;  %v1018_v59 = vshrl.u32 %v3512_v46, 16 }
  0x52   : > { %1718 = vmatpush.bf16.msra.mxu3 %v3103_v60  ;;  %1877 = vmatpush.bf16.msra.mxu0 %v3111_v61  ;;  %v1022_v60 = vshll.u32 %v3531_v58, 16  ;;  %v3106_v61 = vld [vmem:[%s3883_s1 + $0x208] sm:$0xff] }
  0x54   : > { %1453 = vmatpush.bf16.msra.mxu2 %v3087_v63  ;;  %1259 = vmatpush.bf16.msra.mxu1 %v3071_v0  ;;  %v576_v63 = vrot.slane %v3238_v7, 1  ;;  %v1020_v0 = vor.u32 %v1018_v59, %v1016_v51  ;;  %v3134_v51 = vld [vmem:[%s3226_s25 + $0x10] sm:$0xe] }
  0x55   : > { %v3135_v59 = vor.u32 %v3134_v51, %v3133_v50 }
  0x56   : > { %1719 = vmatpush.bf16.msra.mxu3 %v3102_v8  ;;  %1878 = vmatpush.bf16.msra.mxu0 %v3110_v1  ;;  %v1024_v8 = vrot.slane %v1022_v60, 1  ;;  %v577_v1 = vsel %vm564_vm1, %v574_v49, %v576_v63 }
  0x58   : > { %1454 = vmatpush.bf16.msra.mxu2 %v3086_v18  ;;  %1260 = vmatpush.bf16.msra.mxu1 %v3070_v20  ;;  %v1025_v3 = vsel %vm264_vm0, %v1020_v0, %v1024_v8  ;;  %v578_v18 = vrot.slane %v3255_v14, 1 }
  0x5a   : > { %1720 = vmatpush.bf16.msra.mxu3 %v3101_v19  ;;  %v579_v25 = vsel %vm564_vm1, %v576_v63, %v578_v18 }
  0x5b   : > { %507 = vmatmul.bf16.gmra.mxu1 %v3259_v16  ;;  %651 = vmatmul.bf16.gmra.mxu2 %v569_v13  ;;  %v3109_v16 = vld [vmem:[%s3883_s1 + $0x220] sm:$0xff]  ;;  %v1026_v13 = vshrl.u32 %v3531_v58, 16 }
  0x5c   : > { %1879 = vmatpush.bf16.msra.mxu0 %v3109_v16  ;;  %1455 = vmatpush.bf16.msra.mxu2 %v3085_v30  ;;  %v913_v16 = vld [vmem:[%s3226_s25 + $0x48] sm:$0x1] }
  0x5d   : > { %845 = vmatmul.bf16.gmra.mxu3 %v3036_v15  ;;  %1111 = vmatmul.bf16.gmra.mxu0 %v993_v17  ;;  %v1030_v15 = vshll.u32 %v3553_v12, 16  ;;  %v3105_v17 = vld [vmem:[%s3883_s1 + $0x200] sm:$0xff]  ;;  %v1028_v19 = vor.u32 %v1026_v13, %v1024_v8  ;;  %v1803_v8 = vrot.slane %v3135_v59, 1 }
  0x5e   : > { %1721 = vmatpush.bf16.msra.mxu3 %v3100_v31  ;;  %1261 = vmatpush.bf16.msra.mxu1 %v3069_v33 }
  0x5f   : > { %v1032_v20 = vrot.slane %v1030_v15, 1 }
  0x60   : > { %1456 = vmatpush.bf16.msra.mxu2 %v3084_v43 }
  0x61   : > { %v1033_v27 = vsel %vm264_vm0, %v1028_v19, %v1032_v20 }
  0x62   : > { %1722 = vmatpush.bf16.msra.mxu3 %v3099_v44  ;;  %1262 = vmatpush.bf16.msra.mxu1 %v3068_v45  ;;  %v3129_v45 = vld [vmem:[%s3226_s25 + $0x8] sm:$0xf0] }
  0x64   : > { %1457 = vmatpush.bf16.msra.mxu2 %v3083_v56 }
  0x66   : > { %1723 = vmatpush.bf16.msra.mxu3 %v3098_v57 }
  0x68   : > { %1458 = vmatpush.bf16.msra.mxu2 %v3082_v4  ;;  %v3074_v4 = vld [vmem:[%s3226_s25 + $0x10] sm:$0xff] }
  0x6a   : > { %1724 = vmatpush.bf16.msra.mxu3 %v3097_v11 }
  0x6b   : > { %512 = vmatmul.bf16.gmra.mxu1 %v3232_v5  ;;  %656 = vmatmul.bf16.gmra.mxu2 %v571_v28  ;;  %v3108_v5 = vld [vmem:[%s3883_s1 + $0x218] sm:$0xff]  ;;  %v964_v28 = vunpack.c.l.b16 %v913_v16 }
  0x6c   : > { %1880 = vmatpush.bf16.msra.mxu0 %v3108_v5  ;;  %v1034_v5 = vshrl.u32 %v3553_v12, 16 }
  0x6d   : > { %850 = vmatmul.bf16.gmra.mxu3 %v3037_v23  ;;  %1116 = vmatmul.bf16.gmra.mxu0 %v1001_v29  ;;  %v3571_v23 = vpack.c.b16 %v964_v28, %v964_v28 }
  0x6e   : > { %v1036_v36 = vor.u32 %v1034_v5, %v1032_v20  ;;  %v1605_v5 = vshrl.u32 %v3090_v47, 16 }
  0x6f   : > { %v1038_v35 = vshll.u32 %v3571_v23, 16 }
  0x71   : > { %v1040_v37 = vrot.slane %v1038_v35, 1 }
  0x73   : > { %v1041_v44 = vsel %vm264_vm0, %v1036_v36, %v1040_v37 }
  0x7b   : > { %517 = vmatmul.bf16.gmra.mxu1 %v3244_v9  ;;  %661 = vmatmul.bf16.gmra.mxu2 %v573_v40  ;;  %v3107_v9 = vld [vmem:[%s3883_s1 + $0x210] sm:$0xff] }
  0x7c   : > { %1881 = vmatpush.bf16.msra.mxu0 %v3107_v9  ;;  %v3130_v9 = vld [vmem:[%s3226_s25 + $0x8] sm:$0xe] }
  0x7d   : > { %855 = vmatmul.bf16.gmra.mxu3 %v3038_v41  ;;  %1121 = vmatmul.bf16.gmra.mxu0 %v1009_v42  ;;  %v3042_v42 = vld [vmem:[%s3226_s25 + $0x40] sm:$0xff] }
  0x80   : > { %1882 = vmatpush.bf16.msra.mxu0 %v3106_v61  ;;  %v1185_v61 = vrot.slane %v3380_v32, 1  ;;  %v3091_v32 = vld [vmem:[%s3226_s25 + $0x20] sm:$0xff] }
  0x84   : > { %1883 = vmatpush.bf16.msra.mxu0 %v3105_v17 }
  0x8b   : > { %522 = vmatmul.bf16.gmra.mxu1 %v3235_v6  ;;  %666 = vmatmul.bf16.gmra.mxu2 %v575_v52  ;;  %v3067_v6 = vld [vmem:[%s3883_s1 + $0x148] sm:$0xff] }
  0x8c   : > { %1263 = vmatpush.bf16.msra.mxu1 %v3067_v6  ;;  %v1601_v6 = vshll.u32 %v3090_v47, 16 }
  0x8d   : > { %860 = vmatmul.bf16.gmra.mxu3 %v3039_v53  ;;  %1126 = vmatmul.bf16.gmra.mxu0 %v1017_v55  ;;  %v3131_v55 = vor.u32 %v3130_v9, %v3129_v45  ;;  %v3075_v45 = vld [vmem:[%s3226_s25 + $0x18] sm:$0xff] }
  0x8e   : > { %v1603_v0 = vrot.slane %v1601_v6, 1 }
  0x8f   : > { %v1184_v60 = vrot.slane %v3131_v55, 1 }
  0x90   : > { %v1607_v36 = vor.u32 %v1605_v5, %v1603_v0 }
  0x9b   : > { %527 = vmatmul.bf16.gmra.mxu1 %v3247_v10  ;;  %671 = vmatmul.bf16.gmra.mxu2 %v577_v1  ;;  %v3066_v10 = vld [vmem:[%s3883_s1 + $0x140] sm:$0xff]  ;;  %v1804_v1 = vrot.slane %v3090_v47, 1 }
  0x9c   : > { %1264 = vmatpush.bf16.msra.mxu1 %v3066_v10  ;;  %v1186_v10 = vsel %vm564_vm1, %v1184_v60, %v1185_v61 }
  0x9d   : > { %865 = vmatmul.bf16.gmra.mxu3 %v3040_v2  ;;  %1131 = vmatmul.bf16.gmra.mxu0 %v1025_v3 }
  0xa8   : > { %v3565_v22 = vpop.f32.mrf.mxu1 }
  0xaa   : > { %v398_v26 = vpop.f32.mrf.mxu0 }
  0xab   : > { %532 = vmatmul.bf16.gmra.mxu1 %v3238_v7  ;;  %676 = vmatmul.bf16.gmra.mxu2 %v579_v25  ;;  %v580_v7 = vrot.slane %v3314_v54, 1  ;;  %v3132_v54 = vld [vmem:[%s3226_s25 + $0x10] sm:$0xff]  }
  0xac   : > { %v1596_v48 = vshll.u32 %v3132_v54, 16  ;;  %v1594_v57 = vshrl.u32 %v3132_v54, 16 }
  0xad   : > { %870 = vmatmul.bf16.gmra.mxu3 %v3041_v24  ;;  %1136 = vmatmul.bf16.gmra.mxu0 %v1033_v27  ;;  %v581_v41 = vsel %vm564_vm1, %v578_v18, %v580_v7  ;;  %v1805_v18 = vsel %vm564_vm1, %v1803_v8, %v1804_v1  ;;  %v1187_v7 = vrot.slane %v3437_v62, 1 }
  0xae   : > { %v3573_v29 = vpop.f32.mrf.mxu2 }
  0xb0   : > { %v3575_v30 = vpop.f32.mrf.mxu3  ;;  %v3577_v31 = vpop.f32.mrf.mxu1 }
  0xb2   : > { %v400_v33 = vpop.f32.mrf.mxu0 }
  0xb6   : > { %v3582_v38 = vpop.f32.mrf.mxu2 }
  0xb8   : > { %v3584_v39 = vpop.f32.mrf.mxu3  ;;  %v3586_v40 = vpop.f32.mrf.mxu1 }
  0xba   : > { %v3590_v43 = vpop.f32.mrf.mxu0 }
  0xbb   : > { %537 = vmatmul.bf16.gmra.mxu1 %v3255_v14  ;;  %681 = vmatmul.bf16.gmra.mxu2 %v581_v41  ;;  %v1598_v14 = vrot.slane %v1596_v48, 1  ;;  %v1806_v41 = vrot.slane %v3091_v32, 1  ;;  %v1188_v48 = vsel %vm564_vm1, %v1185_v61, %v1187_v7 }
  0xbd   : > { %875 = vmatmul.bf16.gmra.mxu3 %v3042_v42  ;;  %1141 = vmatmul.bf16.gmra.mxu0 %v1041_v44  ;;  %v1599_v63 = vor.u32 %v1598_v14, %v1594_v57  ;;  %v1807_v55 = vsel %vm564_vm1, %v1804_v1, %v1806_v41  ;;  %v3092_v57 = vld [vmem:[%s3226_s25 + $0x28] sm:$0xff]  ;;  %v1189_v1 = vrot.slane %v3468_v21, 1 }
  0xbe   : > { %v3598_v49 = vpop.f32.mrf.mxu2  ;;  %v1617_v8 = vshll.u32 %v3092_v57, 16 }
  0xbf   : > { %v1604_v17 = vsel %vm264_vm0, %v1599_v63, %v1603_v0  ;;  %v1613_v0 = vshrl.u32 %v3091_v32, 16 }
  0xc0   : > { %v3602_v52 = vpop.f32.mrf.mxu3  ;;  %v3604_v53 = vpop.f32.mrf.mxu1 }
  0xc2   : > { %v405_v56 = vpop.f32.mrf.mxu0 }
  0xc6   : > { %v3607_v2 = vpop.f32.mrf.mxu2 }
  0xc8   : > { %v3609_v3 = vpop.f32.mrf.mxu3  ;;  %v503_v11 = vpop.f32.mrf.mxu1 }
  0xc9   : > { %v504_v13 = vadd.f32 %v503_v11, %v398_v26  ;;  %v1609_v26 = vshll.u32 %v3091_v32, 16 }
  0xca   : > { %v1107_v15 = vpop.f32.mrf.mxu0 }
  0xcb   : > { %1265 = vmatmul.bf16.vlgmr.msra.gmra.mxu1 %v1186_v10  ;;  %1459 = vmatmul.bf16.vlgmr.msra.gmra.mxu2 %v3074_v4  ;;  %v1611_v37 = vrot.slane %v1609_v26, 1  ;;  %v1619_v10 = vrot.slane %v1617_v8, 1 }
  0xcd   : > { %1725 = vmatmul.bf16.vlgmr.msra.gmra.mxu3 %v1604_v17  ;;  %1884 = vmatmul.bf16.vlgmr.msra.gmra.mxu0 %v1805_v18  ;;  %v1612_v51 = vsel %vm264_vm0, %v1607_v36, %v1611_v37  ;;  %v1615_v11 = vor.u32 %v1613_v0, %v1611_v37 }
  0xce   : > { %v647_v19 = vpop.f32.mrf.mxu2 }
  0xcf   : > { %v687_v20 = vadd.f32 %v647_v19, %v504_v13  ;;  %v1808_v13 = vrot.slane %v3092_v57, 1  ;;  %v3076_v19 = vld [vmem:[%s3226_s25 + $0x20] sm:$0xff] }
  0xd0   : > { %v841_v16 = vpop.f32.mrf.mxu3  ;;  %v505_v25 = vpop.f32.mrf.mxu1 }
  0xd1   : > { %v881_v24 = vadd.f32 %v841_v16, %v687_v20  ;;  %v506_v27 = vadd.f32 %v505_v25, %v400_v33  ;;  %v1190_v16 = vsel %vm564_vm1, %v1187_v7, %v1189_v1 }
  0xd2   : > { %v1109_v28 = vpop.f32.mrf.mxu0 }
  0xd3   : > { %v3616_v35 = vadd.f32 %v1107_v15, %v881_v24  ;;  %v1620_v24 = vsel %vm264_vm0, %v1615_v11, %v1619_v10 }
  0xd6   : > { %v649_v42 = vpop.f32.mrf.mxu2 }
  0xd7   : > { %v688_v44 = vadd.f32 %v649_v42, %v506_v27  ;;  %v1809_v27 = vsel %vm564_vm1, %v1806_v41, %v1808_v13  ;;  %v1191_v41 = vrot.slane %v3490_v34, 1 }
  0xd8   : > { %v843_v54 = vpop.f32.mrf.mxu3  ;;  %v508_v9 = vpop.f32.mrf.mxu1 }
  0xd9   : > { %v882_v50 = vadd.f32 %v843_v54, %v688_v44  ;;  %v509_v33 = vadd.f32 %v508_v9, %v3590_v43  ;;  %v1621_v44 = vshrl.u32 %v3092_v57, 16 }
  0xda   : > { %v1112_v47 = vpop.f32.mrf.mxu0 }
  0xdb   : > { %1270 = vmatmul.bf16.gmra.mxu1 %v1188_v48  ;;  %1464 = vmatmul.bf16.gmra.mxu2 %v3075_v45  ;;  %v3624_v62 = vadd.f32 %v1109_v28, %v882_v50  ;;  %v3093_v28 = vld [vmem:[%s3226_s25 + $0x30] sm:$0xff]  ;;  %v1623_v9 = vor.u32 %v1621_v44, %v1619_v10 }
  0xdc   : > { %v1625_v54 = vshll.u32 %v3093_v28, 16  ;;  %v1810_v50 = vrot.slane %v3093_v28, 1 }
  0xdd   : > { %1730 = vmatmul.bf16.gmra.mxu3 %v1612_v51  ;;  %1889 = vmatmul.bf16.gmra.mxu0 %v1807_v55  ;;  %v3077_v55 = vld [vmem:[%s3226_s25 + $0x28] sm:$0xff] }
  0xde   : > { %v652_v14 = vpop.f32.mrf.mxu2  ;;  %v1627_v48 = vrot.slane %v1625_v54, 1 }
  0xdf   : > { %v689_v6 = vadd.f32 %v652_v14, %v509_v33 }
  0xe0   : > { %v846_v59 = vpop.f32.mrf.mxu3  ;;  %v510_v60 = vpop.f32.mrf.mxu1 }
  0xe1   : > { %v883_v61 = vadd.f32 %v846_v59, %v689_v6  ;;  %v511_v63 = vadd.f32 %v510_v60, %v405_v56  ;;  %v1192_v6 = vsel %vm564_vm1, %v1189_v1, %v1191_v41  ;;  %v1628_v60 = vsel %vm264_vm0, %v1623_v9, %v1627_v48 }
  0xe2   : > { %v1114_v43 = vpop.f32.mrf.mxu0 }
  0xe3   : > { %v3627_v4 = vadd.f32 %v1112_v47, %v883_v61  ;;  %v1811_v61 = vsel %vm564_vm1, %v1808_v13, %v1810_v50  ;;  %v1193_v13 = vrot.slane %v3512_v46, 1 }
  0xe6   : > { %v654_v15 = vpop.f32.mrf.mxu2 }
  0xe7   : > { %v690_v17 = vadd.f32 %v654_v15, %v511_v63  ;;  %v3094_v63 = vld [vmem:[%s3226_s25 + $0x38] sm:$0xff]  ;;  %v1629_v15 = vshrl.u32 %v3093_v28, 16 }
  0xe8   : > { %v848_v18 = vpop.f32.mrf.mxu3  ;;  %v513_v20 = vpop.f32.mrf.mxu1 }
  0xe9   : > { %v884_v25 = vadd.f32 %v848_v18, %v690_v17  ;;  %v514_v56 = vadd.f32 %v513_v20, %v3565_v22  ;;  %v1633_v17 = vshll.u32 %v3094_v63, 16 }
  0xea   : > { %v1117_v32 = vpop.f32.mrf.mxu0 }
  0xeb   : > { %1275 = vmatmul.bf16.gmra.mxu1 %v1190_v16  ;;  %1469 = vmatmul.bf16.gmra.mxu2 %v3076_v19  ;;  %v3635_v21 = vadd.f32 %v1114_v43, %v884_v25  ;;  %v1631_v19 = vor.u32 %v1629_v15, %v1627_v48  ;;  %v1635_v20 = vrot.slane %v1633_v17, 1  ;;  %v1812_v16 = vrot.slane %v3094_v63, 1 }
  0xec   : > { %v1637_v48 = vshrl.u32 %v3094_v63, 16 }
  0xed   : > { %1735 = vmatmul.bf16.gmra.mxu3 %v1620_v24  ;;  %1894 = vmatmul.bf16.gmra.mxu0 %v1809_v27  ;;  %v3078_v24 = vld [vmem:[%s3226_s25 + $0x30] sm:$0xff]  ;;  %v1636_v28 = vsel %vm264_vm0, %v1631_v19, %v1635_v20 }
  0xee   : > { %v657_v5 = vpop.f32.mrf.mxu2 }
  0xef   : > { %v691_v26 = vadd.f32 %v657_v5, %v514_v56  ;;  %v1194_v5 = vsel %vm564_vm1, %v1191_v41, %v1193_v13 }
  0xf0   : > { %v851_v36 = vpop.f32.mrf.mxu3  ;;  %v515_v7 = vpop.f32.mrf.mxu1 }
  0xf1   : > { %v885_v37 = vadd.f32 %v851_v36, %v691_v26  ;;  %v516_v22 = vadd.f32 %v515_v7, %v3577_v31  ;;  %v1813_v36 = vsel %vm564_vm1, %v1810_v50, %v1812_v16  ;;  %v1195_v50 = vrot.slane %v3531_v58, 1 }
  0xf2   : > { %v1119_v42 = vpop.f32.mrf.mxu0 }
  0xf3   : > { %v3639_v45 = vadd.f32 %v1117_v32, %v885_v37  ;;  %v3095_v37 = vld [vmem:[%s3226_s25 + $0x40] sm:$0xff] }
  0xf4   : > { %v1645_v19 = vshrl.u32 %v3095_v37, 16 }
  0xf6   : > { %v659_v33 = vpop.f32.mrf.mxu2 }
  0xf7   : > { %v692_v47 = vadd.f32 %v659_v33, %v516_v22  ;;  %v1641_v33 = vshll.u32 %v3095_v37, 16 }
  0xf8   : > { %v853_v51 = vpop.f32.mrf.mxu3  ;;  %v518_v14 = vpop.f32.mrf.mxu1 }
  0xf9   : > { %v886_v59 = vadd.f32 %v853_v51, %v692_v47  ;;  %v519_v31 = vadd.f32 %v518_v14, %v3586_v40  ;;  %v1643_v14 = vrot.slane %v1641_v33, 1 }
  0xfa   : > { %v1122_v57 = vpop.f32.mrf.mxu0 }
  0xfb   : > { %1280 = vmatmul.bf16.gmra.mxu1 %v1192_v6  ;;  %1474 = vmatmul.bf16.gmra.mxu2 %v3077_v55  ;;  %v3647_v34 = vadd.f32 %v1119_v42, %v886_v59  ;;  %v1639_v55 = vor.u32 %v1637_v48, %v1635_v20  ;;  %v1814_v6 = vrot.slane %v3095_v37, 1 }
  0xfd   : > { %1740 = vmatmul.bf16.gmra.mxu3 %v1628_v60  ;;  %1899 = vmatmul.bf16.gmra.mxu0 %v1811_v61  ;;  %v1196_v61 = vsel %vm564_vm1, %v1193_v13, %v1195_v50 }
  0xfe   : > { %v662_v43 = vpop.f32.mrf.mxu2 }
  0xff   : > { %v693_v0 = vadd.f32 %v662_v43, %v519_v31 }
 0x100   : > { %v856_v8 = vpop.f32.mrf.mxu3  ;;  %v520_v1 = vpop.f32.mrf.mxu1 }
 0x101   : > { %v887_v11 = vadd.f32 %v856_v8, %v693_v0  ;;  %v521_v40 = vadd.f32 %v520_v1, %v3604_v53  ;;  %v1644_v0 = vsel %vm264_vm0, %v1639_v55, %v1643_v14  ;;  %v1815_v8 = vsel %vm564_vm1, %v1812_v16, %v1814_v6  ;;  %v3096_v1 = vld [vmem:[%s3226_s25 + $0x48] sm:$0xff] }
 0x102   : > { %v1124_v10 = vpop.f32.mrf.mxu0  ;;  %v1649_v20 = vshll.u32 %v3096_v1, 16 }
 0x103   : > { %v3651_v18 = vadd.f32 %v1122_v57, %v887_v11  ;;  %v3079_v57 = vld [vmem:[%s3226_s25 + $0x38] sm:$0xff] }
 0x106   : > { %v664_v25 = vpop.f32.mrf.mxu2 }
 0x107   : > { %v694_v56 = vadd.f32 %v664_v25, %v521_v40  ;;  %v1197_v25 = vrot.slane %v3553_v12, 1 }
 0x108   : > { %v858_v32 = vpop.f32.mrf.mxu3  ;;  %v523_v27 = vpop.f32.mrf.mxu1 }
 0x109   : > { %v888_v26 = vadd.f32 %v858_v32, %v694_v56  ;;  %v524_v7 = vadd.f32 %v523_v27, %v3573_v29  ;;  %v1647_v32 = vor.u32 %v1645_v19, %v1643_v14  ;;  %v1653_v14 = vshrl.u32 %v3096_v1, 16 }
 0x10a   : > { %v1127_v53 = vpop.f32.mrf.mxu0 }
 0x10b   : > { %1285 = vmatmul.bf16.gmra.mxu1 %v1194_v5  ;;  %1479 = vmatmul.bf16.gmra.mxu2 %v3078_v24  ;;  %v3658_v46 = vadd.f32 %v1124_v10, %v888_v26  ;;  %v1651_v24 = vrot.slane %v1649_v20, 1  ;;  %v1532_v5 = vld [vmem:[%s3226_s25 + $0x50] sm:$0x1] }
 0x10c   : > { %v1583_v12 = vunpack.c.l.b16 %v1532_v5 }
 0x10d   : > { %1745 = vmatmul.bf16.gmra.mxu3 %v1636_v28  ;;  %1904 = vmatmul.bf16.gmra.mxu0 %v1813_v36  ;;  %v3080_v28 = vld [vmem:[%s3226_s25 + $0x40] sm:$0xff] }
 0x10e   : > { %v667_v22 = vpop.f32.mrf.mxu2 }
 0x10f   : > { %v695_v42 = vadd.f32 %v667_v22, %v524_v7  ;;  %v1198_v7 = vsel %vm564_vm1, %v1195_v50, %v1197_v25 }
 0x110   : > { %v861_v44 = vpop.f32.mrf.mxu3  ;;  %v525_v54 = vpop.f32.mrf.mxu1 }
 0x111   : > { %v889_v41 = vadd.f32 %v861_v44, %v695_v42  ;;  %v526_v51 = vadd.f32 %v525_v54, %v3582_v38  ;;  %v1652_v42 = vsel %vm264_vm0, %v1647_v32, %v1651_v24 }
 0x112   : > { %v1129_v9 = vpop.f32.mrf.mxu0 }
 0x113   : > { %v3662_v47 = vadd.f32 %v1127_v53, %v889_v41  ;;  %v1592_v41 = vpack.c.b16 %v1583_v12, %v1583_v12 }
 0x116   : > { %v669_v29 = vpop.f32.mrf.mxu2 }
 0x117   : > { %v696_v59 = vadd.f32 %v669_v29, %v526_v51  ;;  %v1657_v29 = vshll.u32 %v1592_v41, 16 }
 0x118   : > { %v863_v31 = vpop.f32.mrf.mxu3  ;;  %v528_v60 = vpop.f32.mrf.mxu1 }
 0x119   : > { %v890_v43 = vadd.f32 %v863_v31, %v696_v59  ;;  %v529_v38 = vadd.f32 %v528_v60, %v3598_v49  ;;  %v1816_v49 = vrot.slane %v3096_v1, 1  ;;  %v1199_v59 = vrot.slane %v3571_v23, 1 }
 0x11a   : > { %v1132_v63 = vpop.f32.mrf.mxu0  ;;  %v1659_v60 = vrot.slane %v1657_v29, 1 }
 0x11b   : > { %1290 = vmatmul.bf16.gmra.mxu1 %v1196_v61  ;;  %1484 = vmatmul.bf16.gmra.mxu2 %v3079_v57  ;;  %v3670_v58 = vadd.f32 %v1129_v9, %v890_v43  ;;  %v1817_v44 = vsel %vm564_vm1, %v1814_v6, %v1816_v49  ;;  %v1655_v57 = vor.u32 %v1653_v14, %v1651_v24  ;;  %v1818_v61 = vrot.slane %v1592_v41, 1 }
 0x11d   : > { %1750 = vmatmul.bf16.gmra.mxu3 %v1644_v0  ;;  %1909 = vmatmul.bf16.gmra.mxu0 %v1815_v8  ;;  %v3081_v0 = vld [vmem:[%s3226_s25 + $0x48] sm:$0xff]  ;;  %v1660_v1 = vsel %vm264_vm0, %v1655_v57, %v1659_v60 }
 0x11e   : > { %v672_v11 = vpop.f32.mrf.mxu2 }
 0x11f   : > { %v697_v40 = vadd.f32 %v672_v11, %v529_v38  ;;  %v1200_v38 = vsel %vm564_vm1, %v1197_v25, %v1199_v59 }
 0x120   : > { %v866_v10 = vpop.f32.mrf.mxu3  ;;  %v530_v15 = vpop.f32.mrf.mxu1 }
 0x121   : > { %v891_v17 = vadd.f32 %v866_v10, %v697_v40  ;;  %v531_v56 = vadd.f32 %v530_v15, %v3607_v2  ;;  %v1819_v10 = vsel %vm564_vm1, %v1816_v49, %v1818_v61 }
 0x122   : > { %v1134_v13 = vpop.f32.mrf.mxu0 }
 0x123   : > { %v3674_v16 = vadd.f32 %v1132_v63, %v891_v17 }
 0x126   : > { %v674_v27 = vpop.f32.mrf.mxu2 }
 0x127   : > { %v698_v26 = vadd.f32 %v674_v27, %v531_v56 }
 0x128   : > { %v868_v53 = vpop.f32.mrf.mxu3  ;;  %v533_v36 = vpop.f32.mrf.mxu1 }
 0x129   : > { %v892_v22 = vadd.f32 %v868_v53, %v698_v26  ;;  %v534_v54 = vadd.f32 %v533_v36, %v3575_v30 }
 0x12a   : > { %v1137_v37 = vpop.f32.mrf.mxu0 }
 0x12b   : > { %1295 = vmatmul.bf16.gmra.mxu1 %v1198_v7  ;;  %1489 = vmatmul.bf16.gmra.mxu2 %v3080_v28  ;;  %v3683_v2 = vadd.f32 %v1134_v13, %v892_v22 }
 0x12d   : > { %1755 = vmatmul.bf16.gmra.mxu3 %v1652_v42  ;;  %1914 = vmatmul.bf16.gmra.mxu0 %v1817_v44 }
 0x12e   : > { %v677_v9 = vpop.f32.mrf.mxu2 }
 0x12f   : > { %v699_v48 = vadd.f32 %v677_v9, %v534_v54 }
 0x130   : > { %v871_v33 = vpop.f32.mrf.mxu3  ;;  %v535_v50 = vpop.f32.mrf.mxu1 }
 0x131   : > { %v893_v51 = vadd.f32 %v871_v33, %v699_v48  ;;  %v536_v31 = vadd.f32 %v535_v50, %v3584_v39 }
 0x132   : > { %v1139_v55 = vpop.f32.mrf.mxu0 }
 0x133   : > { %v3686_v6 = vadd.f32 %v1137_v37, %v893_v51 }
 0x136   : > { %v679_v30 = vpop.f32.mrf.mxu2 }
 0x137   : > { %v700_v43 = vadd.f32 %v679_v30, %v536_v31 }
 0x138   : > { %v873_v63 = vpop.f32.mrf.mxu3  ;;  %v538_v8 = vpop.f32.mrf.mxu1 }
 0x139   : > { %v894_v11 = vadd.f32 %v873_v63, %v700_v43  ;;  %v539_v39 = vadd.f32 %v538_v8, %v3602_v52 }
 0x13a   : > { %v1142_v40 = vpop.f32.mrf.mxu0 }
 0x13b   : > { %1300 = vmatmul.bf16.gmra.mxu1 %v1200_v38  ;;  %1494 = vmatmul.bf16.gmra.mxu2 %v3081_v0  ;;  %v3694_v23 = vadd.f32 %v1139_v55, %v894_v11  ;;  %v3710_v55 = vld [vmem:[%s3884_s2] ss:$0 sm:$0xff] }
 0x13d   : > { %1760 = vmatmul.bf16.gmra.mxu3 %v1660_v1  ;;  %1919 = vmatmul.bf16.gmra.mxu0 %v1819_v10 }
 0x13e   : > { %v682_v15 = vpop.f32.mrf.mxu2 }
 0x13f   : > { %v701_v17 = vadd.f32 %v682_v15, %v539_v39 }
 0x140   : > { %v876_v13 = vpop.f32.mrf.mxu3  ;;  %v540_v19 = vpop.f32.mrf.mxu1 }
 0x141   : > { %v895_v20 = vadd.f32 %v876_v13, %v701_v17  ;;  %v541_v32 = vadd.f32 %v540_v19, %v3609_v3 }
 0x142   : > { %v1144_v25 = vpop.f32.mrf.mxu0 }
 0x143   : > { %v3697_v56 = vadd.f32 %v1142_v40, %v895_v20 }
 0x146   : > { %v684_v24 = vpop.f32.mrf.mxu2 }
 0x147   : > { %v702_v49 = vadd.f32 %v684_v24, %v541_v32 }
 0x148   : > { %v878_v27 = vpop.f32.mrf.mxu3  ;;  %v1266_v5 = vpop.f32.mrf.mxu1 }
 0x149   : > { %v896_v26 = vadd.f32 %v878_v27, %v702_v49  ;;  %v1306_v53 = vadd.f32 %v1266_v5, %v3616_v35 }
 0x14a   : > { %v1885_v28 = vpop.f32.mrf.mxu0 }
 0x14b   : > { %v3701_v36 = vadd.f32 %v1144_v25, %v896_v26 }
 0x14e   : > { %v1460_v52 = vpop.f32.mrf.mxu2 }
 0x14f   : > { %v1500_v7 = vadd.f32 %v1460_v52, %v1306_v53 }
 0x150   : > { %v1726_v22 = vpop.f32.mrf.mxu3  ;;  %v1268_v37 = vpop.f32.mrf.mxu1 }
 0x151   : > { %v1766_v42 = vadd.f32 %v1726_v22, %v1500_v7  ;;  %v1307_v44 = vadd.f32 %v1268_v37, %v3624_v62 }
 0x152   : > { %v1887_v12 = vpop.f32.mrf.mxu0 }
 0x153   : > { %v1925_v54 = vadd.f32 %v1885_v28, %v1766_v42 }
 0x155   : > { %v3713_v31 = vadd.f32 %v3710_v55, %v1925_v54 }
 0x156   : > { %v1462_v3 = vpop.f32.mrf.mxu2 }
 0x157   : > { %v1501_v41 = vadd.f32 %v1462_v3, %v1307_v44  ;;  %v2224_v30 = vmul.f32 %v3713_v31, %v3713_v31  ;;  %v2187_v0 = vsel %vm2186_vm2, %v3713_v31, 0.0 }
 0x158   : > { %v1728_v9 = vpop.f32.mrf.mxu3  ;;  %v1271_v48 = vpop.f32.mrf.mxu1 }
 0x159   : > { %v1767_v33 = vadd.f32 %v1728_v9, %v1501_v41  ;;  %v1308_v50 = vadd.f32 %v1271_v48, %v3627_v4  ;;  %v2240_v10 = vsel %vm2186_vm2, %v2224_v30, 0.0 }
 0x15a   : > { %v1890_v35 = vpop.f32.mrf.mxu0 }
 0x15b   : > { %v3705_v51 = vadd.f32 %v1887_v12, %v1767_v33 }
 0x15e   : > { %v1465_v14 = vpop.f32.mrf.mxu2 }
 0x15f   : > { %v1502_v29 = vadd.f32 %v1465_v14, %v1308_v50 }
 0x160   : > { %v1731_v62 = vpop.f32.mrf.mxu3  ;;  %v1273_v59 = vpop.f32.mrf.mxu1 }
 0x161   : > { %v1768_v57 = vadd.f32 %v1731_v62, %v1502_v29  ;;  %v1309_v60 = vadd.f32 %v1273_v59, %v3635_v21 }
 0x162   : > { %v1892_v61 = vpop.f32.mrf.mxu0 }
 0x163   : > { %v1927_v4 = vadd.f32 %v1890_v35, %v1768_v57 }
 0x165   : > { %v3719_v43 = vadd.f32 %v3710_v55, %v1927_v4 }
 0x166   : > { %v1467_v63 = vpop.f32.mrf.mxu2 }
 0x167   : > { %v2190_v8 = vsel %vm2186_vm2, %v3719_v43, 0.0  ;;  %v2226_v38 = vmul.f32 %v3719_v43, %v3719_v43  ;;  %v1503_v21 = vadd.f32 %v1467_v63, %v1309_v60 }
 0x168   : > { %v1733_v11 = vpop.f32.mrf.mxu3  ;;  %v2191_v40 = vadd.f32 %v2190_v8, %v2187_v0  ;;  %v1276_v1 = vpop.f32.mrf.mxu1 }
 0x169   : > { %v2243_v39 = vsel %vm2186_vm2, %v2226_v38, 0.0  ;;  %v1769_v15 = vadd.f32 %v1733_v11, %v1503_v21  ;;  %v1310_v17 = vadd.f32 %v1276_v1, %v3639_v45 }
 0x16a   : > { %v1895_v13 = vpop.f32.mrf.mxu0  ;;  %v2244_v19 = vadd.f32 %v2243_v39, %v2240_v10 }
 0x16b   : > { %v3730_v20 = vadd.f32 %v1892_v61, %v1769_v15 }
 0x16e   : > { %v1470_v25 = vpop.f32.mrf.mxu2 }
 0x16f   : > { %v1504_v32 = vadd.f32 %v1470_v25, %v1310_v17 }
 0x170   : > { %v1736_v24 = vpop.f32.mrf.mxu3  ;;  %v1278_v49 = vpop.f32.mrf.mxu1 }
 0x171   : > { %v1770_v27 = vadd.f32 %v1736_v24, %v1504_v32  ;;  %v1311_v5 = vadd.f32 %v1278_v49, %v3647_v34 }
 0x172   : > { %v1897_v26 = vpop.f32.mrf.mxu0 }
 0x173   : > { %v1929_v53 = vadd.f32 %v1895_v13, %v1770_v27 }
 0x175   : > { %v3734_v28 = vadd.f32 %v3710_v55, %v1929_v53 }
 0x176   : > { %v1472_v52 = vpop.f32.mrf.mxu2 }
 0x177   : > { %v2194_v45 = vsel %vm2186_vm2, %v3734_v28, 0.0  ;;  %v2228_v7 = vmul.f32 %v3734_v28, %v3734_v28  ;;  %v1505_v22 = vadd.f32 %v1472_v52, %v1311_v5 }
 0x178   : > { %v1738_v37 = vpop.f32.mrf.mxu3  ;;  %v2195_v42 = vadd.f32 %v2194_v45, %v2191_v40  ;;  %v1281_v44 = vpop.f32.mrf.mxu1 }
 0x179   : > { %v2247_v12 = vsel %vm2186_vm2, %v2228_v7, 0.0  ;;  %v1771_v54 = vadd.f32 %v1738_v37, %v1505_v22  ;;  %v1312_v9 = vadd.f32 %v1281_v44, %v3651_v18 }
 0x17a   : > { %v1900_v34 = vpop.f32.mrf.mxu0  ;;  %v2248_v3 = vadd.f32 %v2247_v12, %v2244_v19 }
 0x17b   : > { %v3741_v41 = vadd.f32 %v1897_v26, %v1771_v54 }
 0x17e   : > { %v1475_v48 = vpop.f32.mrf.mxu2 }
 0x17f   : > { %v1506_v33 = vadd.f32 %v1475_v48, %v1312_v9 }
 0x180   : > { %v1741_v50 = vpop.f32.mrf.mxu3  ;;  %v1283_v35 = vpop.f32.mrf.mxu1 }
 0x181   : > { %v1772_v14 = vadd.f32 %v1741_v50, %v1506_v33  ;;  %v1313_v29 = vadd.f32 %v1283_v35, %v3658_v46 }
 0x182   : > { %v1902_v62 = vpop.f32.mrf.mxu0 }
 0x183   : > { %v1931_v59 = vadd.f32 %v1900_v34, %v1772_v14 }
 0x185   : > { %v3746_v57 = vadd.f32 %v3710_v55, %v1931_v59 }
 0x186   : > { %v1477_v60 = vpop.f32.mrf.mxu2 }
 0x187   : > { %v2198_v61 = vsel %vm2186_vm2, %v3746_v57, 0.0  ;;  %v2230_v4 = vmul.f32 %v3746_v57, %v3746_v57  ;;  %v1507_v18 = vadd.f32 %v1477_v60, %v1313_v29 }
 0x188   : > { %v1743_v30 = vpop.f32.mrf.mxu3  ;;  %v2199_v63 = vadd.f32 %v2198_v61, %v2195_v42  ;;  %v1286_v0 = vpop.f32.mrf.mxu1 }
 0x189   : > { %v2251_v8 = vsel %vm2186_vm2, %v2230_v4, 0.0  ;;  %v1773_v38 = vadd.f32 %v1743_v30, %v1507_v18  ;;  %v1314_v40 = vadd.f32 %v1286_v0, %v3662_v47 }
 0x18a   : > { %v1905_v46 = vpop.f32.mrf.mxu0  ;;  %v2252_v21 = vadd.f32 %v2251_v8, %v2248_v3 }
 0x18b   : > { %v3753_v11 = vadd.f32 %v1902_v62, %v1773_v38 }
 0x18e   : > { %v1480_v1 = vpop.f32.mrf.mxu2 }
 0x18f   : > { %v1508_v10 = vadd.f32 %v1480_v1, %v1314_v40 }
 0x190   : > { %v1746_v39 = vpop.f32.mrf.mxu3  ;;  %v1288_v15 = vpop.f32.mrf.mxu1 }
 0x191   : > { %v1774_v17 = vadd.f32 %v1746_v39, %v1508_v10  ;;  %v1315_v13 = vadd.f32 %v1288_v15, %v3670_v58 }
 0x192   : > { %v1907_v19 = vpop.f32.mrf.mxu0 }
 0x193   : > { %v1933_v25 = vadd.f32 %v1905_v46, %v1774_v17 }
 0x195   : > { %v3758_v32 = vadd.f32 %v3710_v55, %v1933_v25 }
 0x196   : > { %v1482_v24 = vpop.f32.mrf.mxu2 }
 0x197   : > { %v2202_v49 = vsel %vm2186_vm2, %v3758_v32, 0.0  ;;  %v2232_v27 = vmul.f32 %v3758_v32, %v3758_v32  ;;  %v1509_v47 = vadd.f32 %v1482_v24, %v1315_v13 }
 0x198   : > { %v1748_v5 = vpop.f32.mrf.mxu3  ;;  %v2203_v26 = vadd.f32 %v2202_v49, %v2199_v63  ;;  %v1291_v53 = vpop.f32.mrf.mxu1 }
 0x199   : > { %v2255_v52 = vsel %vm2186_vm2, %v2232_v27, 0.0  ;;  %v1775_v45 = vadd.f32 %v1748_v5, %v1509_v47  ;;  %v1316_v37 = vadd.f32 %v1291_v53, %v3674_v16 }
 0x19a   : > { %v2256_v58 = vadd.f32 %v2255_v52, %v2252_v21  ;;  %v1910_v7 = vpop.f32.mrf.mxu0 }
 0x19b   : > { %v3765_v22 = vadd.f32 %v1907_v19, %v1775_v45 }
 0x19e   : > { %v1485_v42 = vpop.f32.mrf.mxu2 }
 0x19f   : > { %v1510_v44 = vadd.f32 %v1485_v42, %v1316_v37 }
 0x1a0   : > { %v1751_v12 = vpop.f32.mrf.mxu3  ;;  %v1293_v54 = vpop.f32.mrf.mxu1 }
 0x1a1   : > { %v1776_v34 = vadd.f32 %v1751_v12, %v1510_v44  ;;  %v1317_v3 = vadd.f32 %v1293_v54, %v3683_v2 }
 0x1a2   : > { %v1912_v48 = vpop.f32.mrf.mxu0 }
 0x1a3   : > { %v1935_v9 = vadd.f32 %v1910_v7, %v1776_v34 }
 0x1a5   : > { %v3770_v33 = vadd.f32 %v3710_v55, %v1935_v9 }
 0x1a6   : > { %v1487_v50 = vpop.f32.mrf.mxu2 }
 0x1a7   : > { %v2206_v35 = vsel %vm2186_vm2, %v3770_v33, 0.0  ;;  %v2234_v14 = vmul.f32 %v3770_v33, %v3770_v33  ;;  %v1511_v16 = vadd.f32 %v1487_v50, %v1317_v3 }
 0x1a8   : > { %v1753_v29 = vpop.f32.mrf.mxu3  ;;  %v2207_v62 = vadd.f32 %v2206_v35, %v2203_v26  ;;  %v1296_v59 = vpop.f32.mrf.mxu1 }
 0x1a9   : > { %v2259_v60 = vsel %vm2186_vm2, %v2234_v14, 0.0  ;;  %v1777_v61 = vadd.f32 %v1753_v29, %v1511_v16  ;;  %v1318_v18 = vadd.f32 %v1296_v59, %v3686_v6 }
 0x1aa   : > { %v2260_v2 = vadd.f32 %v2259_v60, %v2256_v58  ;;  %v1915_v30 = vpop.f32.mrf.mxu0 }
 0x1ab   : > { %v1936_v4 = vadd.f32 %v1912_v48, %v1777_v61 }
 0x1ae   : > { %v1490_v63 = vpop.f32.mrf.mxu2 }
 0x1af   : > { %v1512_v0 = vadd.f32 %v1490_v63, %v1318_v18 }
 0x1b0   : > { %v1756_v8 = vpop.f32.mrf.mxu3  ;;  %v1298_v38 = vpop.f32.mrf.mxu1 }
 0x1b1   : > { %v1778_v46 = vadd.f32 %v1756_v8, %v1512_v0  ;;  %v1946_v0 = vadd.f32 %v3710_v55, %v3705_v51  ;;  %v1948_v8 = vadd.f32 %v3710_v55, %v3730_v20 }
 0x1b2   : > { %v1917_v6 = vpop.f32.mrf.mxu0 }
 0x1b3   : > { %v1937_v21 = vadd.f32 %v1915_v30, %v1778_v46  ;;  %v1952_v46 = vadd.f32 %v3710_v55, %v3753_v11 }
 0x1b5   : > { %v3779_v40 = vadd.f32 %v3710_v55, %v1937_v21 }
 0x1b6   : > { %v1492_v1 = vpop.f32.mrf.mxu2 }
 0x1b7   : > { %v2210_v10 = vsel %vm2186_vm2, %v3779_v40, 0.0  ;;  %v2236_v39 = vmul.f32 %v3779_v40, %v3779_v40 }
 0x1b8   : > { %v1758_v15 = vpop.f32.mrf.mxu3  ;;  %v2211_v17 = vadd.f32 %v2210_v10, %v2207_v62  ;;  %v1301_v25 = vpop.f32.mrf.mxu1  ;;  %v1954_v10 = vadd.f32 %v3710_v55, %v3765_v22 }
 0x1b9   : > { %v2263_v13 = vsel %vm2186_vm2, %v2236_v39, 0.0  ;;  %v1320_v24 = vadd.f32 %v1301_v25, %v3697_v56  ;;  %v1319_v56 = vadd.f32 %v1298_v38, %v3694_v23  ;;  %v1950_v38 = vadd.f32 %v3710_v55, %v3741_v41 }
 0x1ba   : > { %v2264_v19 = vadd.f32 %v2263_v13, %v2260_v2  ;;  %v1920_v26 = vpop.f32.mrf.mxu0  ;;  %v1956_v39 = vadd.f32 %v3710_v55, %v1936_v4 }
 0x1bb   : > { %v1513_v3 = vadd.f32 %v1492_v1, %v1319_v56 }
 0x1bd   : > { %v1779_v29 = vadd.f32 %v1758_v15, %v1513_v3 }
 0x1be   : > { %v1495_v49 = vpop.f32.mrf.mxu2 }
 0x1bf   : > { %v1514_v27 = vadd.f32 %v1495_v49, %v1320_v24  ;;  %v1938_v18 = vadd.f32 %v1917_v6, %v1779_v29 }
 0x1c0   : > { %v1761_v47 = vpop.f32.mrf.mxu3  ;;  %v1303_v45 = vpop.f32.mrf.mxu1 }
 0x1c1   : > { %v1780_v5 = vadd.f32 %v1761_v47, %v1514_v27  ;;  %v1321_v12 = vadd.f32 %v1303_v45, %v3701_v36  ;;  %v1958_v15 = vadd.f32 %v3710_v55, %v1938_v18 }
 0x1c2   : > { %v1922_v23 = vpop.f32.mrf.mxu0 }
 0x1c3   : > { %v1939_v53 = vadd.f32 %v1920_v26, %v1780_v5 }
 0x1c5   : > { %v3788_v52 = vadd.f32 %v3710_v55, %v1939_v53 }
 0x1c6   : > { %v1497_v42 = vpop.f32.mrf.mxu2 }
 0x1c7   : > { %v2214_v58 = vsel %vm2186_vm2, %v3788_v52, 0.0  ;;  %v2238_v7 = vmul.f32 %v3788_v52, %v3788_v52  ;;  %v1515_v9 = vadd.f32 %v1497_v42, %v1321_v12 }
 0x1c8   : > { %v2215_v37 = vadd.f32 %v2214_v58, %v2211_v17  ;;  %v1763_v16 = vpop.f32.mrf.mxu3 }
 0x1c9   : > { %v2267_v44 = vsel %vm2186_vm2, %v2238_v7, 0.0  ;;  %v1781_v62 = vadd.f32 %v1763_v16, %v1515_v9 }
 0x1ca   : > { %v2218_v54 = vrot.slane %v2215_v37, 4  ;;  %v2268_v34 = vadd.f32 %v2267_v44, %v2264_v19 }
 0x1cb   : > { %v1940_v30 = vadd.f32 %v1922_v23, %v1781_v62 }
 0x1cc   : > { %v2219_v48 = vadd.f32 %v2218_v54, %v2215_v37  ;;  %v2271_v50 = vrot.slane %v2268_v34, 4 }
 0x1cd   : > { %v3812_v51 = vadd.f32 %v3710_v55, %v1940_v30 }
 0x1ce   : > { %v2220_v35 = vrot.slane %v2219_v48, 2  ;;  %v2272_v14 = vadd.f32 %v2271_v50, %v2268_v34 }
 0x1d0   : > { %v2221_v59 = vadd.f32 %v2220_v35, %v2219_v48  ;;  %v2273_v60 = vrot.slane %v2272_v14, 2 }
 0x1d2   : > { %v2222_v61 = vrot.slane %v2221_v59, 1  ;;  %v2274_v2 = vadd.f32 %v2273_v60, %v2272_v14 }
 0x1d4   : > { %v2223_v63 = vadd.f32 %v2222_v61, %v2221_v59  ;;  %v2275_v36 = vrot.slane %v2274_v2, 1 }
 0x1d6   : > { %v2276_v21 = vadd.f32 %v2275_v36, %v2274_v2  ;;  %v3805_v1 = vmul.f32 0.015625, %v2223_v63 }
 0x1d8   : > { %v2278_v20 = vmul.f32 0.015625, %v2276_v21  ;;  %v2279_v41 = vmul.f32 %v3805_v1, %v3805_v1  ;;  %v2282_v11 = vsub.f32 %v3713_v31, %v3805_v1  ;;  %v2283_v17 = vsub.f32 %v1946_v0, %v3805_v1 }
 0x1d9   : > { %v2284_v6 = vsub.f32 %v3719_v43, %v3805_v1  ;;  %v2285_v22 = vsub.f32 %v1948_v8, %v3805_v1  ;;  %v2286_v4 = vsub.f32 %v3734_v28, %v3805_v1  ;;  %v2287_v55 = vsub.f32 %v1950_v38, %v3805_v1 }
 0x1da   : > { %v2280_v13 = vsub.f32 %v2278_v20, %v2279_v41  ;;  %v2288_v19 = vsub.f32 %v3746_v57, %v3805_v1  ;;  %v2289_v25 = vsub.f32 %v1952_v46, %v3805_v1  ;;  %v2290_v31 = vsub.f32 %v3758_v32, %v3805_v1 }
 0x1db   : > { %v2291_v24 = vsub.f32 %v1954_v10, %v3805_v1  ;;  %v2292_v43 = vsub.f32 %v3770_v33, %v3805_v1  ;;  %v2293_v49 = vsub.f32 %v1956_v39, %v3805_v1  ;;  %v2294_v28 = vsub.f32 %v3779_v40, %v3805_v1 }
 0x1dc   : > { %v2281_v27 = vmax.f32 %v2280_v13, 0.0  ;;  %v2295_v47 = vsub.f32 %v1958_v15, %v3805_v1  ;;  %v2296_v57 = vsub.f32 %v3788_v52, %v3805_v1  ;;  %v2297_v5 = vsub.f32 %v3812_v51, %v3805_v1 }
 0x1de   : > { %v2298_v32 = vadd.f32 1e-05, %v2281_v27 }
 0x1e0   : > { %3170 = vrsqrt.f32 %v2298_v32  ;;  %vm2305_vm4 = vweird.f32 %v2298_v32 }
 0x1e6   : > { %v3171_v26 = vpop.eup %3170 }
 0x1e7   : > { %v2300_v53 = vmul.f32 %v3171_v26, %v2298_v32  ;;  %vm2306_vm3 = vweird.f32 %v3171_v26 }
 0x1e8   : > { %vm2307_vm5 = vmor %vm2305_vm4, %vm2306_vm3 }
 0x1e9   : > { %v2301_v45 = vmul.f32 %v3171_v26, %v2300_v53 }
 0x1eb   : > { %v2302_v33 = vmul.f32 0.5, %v2301_v45 }
 0x1ed   : > { %v2303_v58 = vsub.f32 1.5, %v2302_v33 }
 0x1ef   : > { %v2304_v7 = vmul.f32 %v3171_v26, %v2303_v58 }
 0x1f1   : > { %v2308_v40 = vsel %vm2307_vm5, %v3171_v26, %v2304_v7 }
 0x1f2   : > { %v2309_v37 = vmul.f32 %v2308_v40, %v2282_v11  ;;  %v2310_v42 = vmul.f32 %v2308_v40, %v2283_v17  ;;  %v2311_v56 = vmul.f32 %v2308_v40, %v2284_v6  ;;  %v2312_v52 = vmul.f32 %v2308_v40, %v2285_v22 }
 0x1f3   : > { %v2313_v44 = vmul.f32 %v2308_v40, %v2286_v4  ;;  %v2314_v12 = vmul.f32 %v2308_v40, %v2287_v55  ;;  %v2315_v54 = vmul.f32 %v2308_v40, %v2288_v19  ;;  %v2316_v34 = vmul.f32 %v2308_v40, %v2289_v25 }
 0x1f4   : > { %v2317_v3 = vmul.f32 %v2308_v40, %v2290_v31  ;;  %v2318_v9 = vmul.f32 %v2308_v40, %v2291_v24  ;;  %v2319_v48 = vmul.f32 %v2308_v40, %v2292_v43  ;;  %v2320_v50 = vmul.f32 %v2308_v40, %v2293_v49 }
 0x1f5   : > { %v2321_v35 = vmul.f32 %v2308_v40, %v2294_v28  ;;  %v2322_v14 = vmul.f32 %v2308_v40, %v2295_v47  ;;  %v2323_v16 = vmul.f32 %v2308_v40, %v2296_v57  ;;  %v2325_v29 = vmax.f32 %v2309_v37, 0.0 }
 0x1f6   : > { %v2326_v62 = vmax.f32 %v2310_v42, 0.0  ;;  %v2327_v59 = vmax.f32 %v2311_v56, 0.0  ;;  %v2328_v60 = vmax.f32 %v2312_v52, 0.0  ;;  %v2329_v61 = vmax.f32 %v2313_v44, 0.0 }
 0x1f7   : > { %v2330_v2 = vmax.f32 %v2314_v12, 0.0  ;;  %v2331_v23 = vmax.f32 %v2315_v54, 0.0  ;;  %v2341_v18 = vpack.c.bf16 %v2325_v29, %v2325_v29  ;;  %v2332_v63 = vmax.f32 %v2316_v34, 0.0 }
 0x1f8   : > { %v2342_v30 = vpack.c.bf16 %v2326_v62, %v2326_v62  ;;  %v2343_v36 = vpack.c.bf16 %v2327_v59, %v2327_v59  ;;  %v2344_v0 = vpack.c.bf16 %v2328_v60, %v2328_v60  ;;  %v2333_v8 = vmax.f32 %v2317_v3, 0.0 }
 0x1f9   : > { %v2345_v38 = vpack.c.bf16 %v2329_v61, %v2329_v61  ;;  %2358 = vst.msk [vmem:[%s3845_s21] sm:$0xf] %vm2357_vm6, %v2341_v18  ;;  %v2334_v46 = vmax.f32 %v2318_v9, 0.0  ;;  %v2346_v21 = vpack.c.bf16 %v2330_v2, %v2330_v2  ;;  %v2335_v1 = vmax.f32 %v2319_v48, 0.0 }
 0x1fa   : > { %2359 = vst.msk [vmem:[%s3845_s21 + $0x4] sm:$0xf] %vm2357_vm6, %v2342_v30  ;;  %v2347_v10 = vpack.c.bf16 %v2331_v23, %v2331_v23  ;;  %v2324_v39 = vmul.f32 %v2308_v40, %v2297_v5  ;;  %v2336_v15 = vmax.f32 %v2320_v50, 0.0  ;;  %v2348_v51 = vpack.c.bf16 %v2332_v63, %v2332_v63 }
 0x1fb   : > { %2360 = vst.msk [vmem:[%s3845_s21 + $0x8] sm:$0xf] %vm2357_vm6, %v2343_v36  ;;  %v2337_v20 = vmax.f32 %v2321_v35, 0.0  ;;  %v2349_v41 = vpack.c.bf16 %v2333_v8, %v2333_v8  ;;  %v2338_v11 = vmax.f32 %v2322_v14, 0.0  ;;  %v2350_v17 = vpack.c.bf16 %v2334_v46, %v2334_v46 }
 0x1fc   : > { %2361 = vst.msk [vmem:[%s3845_s21 + $0xc] sm:$0xf] %vm2357_vm6, %v2344_v0  ;;  %v2339_v6 = vmax.f32 %v2323_v16, 0.0  ;;  %v2351_v22 = vpack.c.bf16 %v2335_v1, %v2335_v1  ;;  %v2352_v4 = vpack.c.bf16 %v2336_v15, %v2336_v15  ;;  %v2340_v55 = vmax.f32 %v2324_v39, 0.0 }
 0x1fd   : > { %2362 = vst.msk [vmem:[%s3845_s21 + $0x10] sm:$0xf] %vm2357_vm6, %v2345_v38  ;;  %v2353_v13 = vpack.c.bf16 %v2337_v20, %v2337_v20  ;;  %v2354_v19 = vpack.c.bf16 %v2338_v11, %v2338_v11 }
 0x1fe   : > { %2363 = vst.msk [vmem:[%s3845_s21 + $0x14] sm:$0xf] %vm2357_vm6, %v2346_v21  ;;  %v2355_v25 = vpack.c.bf16 %v2339_v6, %v2339_v6  ;;  %v2356_v31 = vpack.c.bf16 %v2340_v55, %v2340_v55 }
 0x1ff   : > { %2364 = vst.msk [vmem:[%s3845_s21 + $0x18] sm:$0xf] %vm2357_vm6, %v2347_v10 }
 0x200   : > { %2365 = vst.msk [vmem:[%s3845_s21 + $0x1c] sm:$0xf] %vm2357_vm6, %v2348_v51 }
 0x201   : > { %2366 = vst.msk [vmem:[%s3845_s21 + $0x20] sm:$0xf] %vm2357_vm6, %v2349_v41 }
 0x202   : > { %2367 = vst.msk [vmem:[%s3845_s21 + $0x24] sm:$0xf] %vm2357_vm6, %v2350_v17 }
 0x203   : > { %2368 = vst.msk [vmem:[%s3845_s21 + $0x28] sm:$0xf] %vm2357_vm6, %v2351_v22 }
 0x204   : > { %2369 = vst.msk [vmem:[%s3845_s21 + $0x2c] sm:$0xf] %vm2357_vm6, %v2352_v4 }
 0x205   : > { %2370 = vst.msk [vmem:[%s3845_s21 + $0x30] sm:$0xf] %vm2357_vm6, %v2353_v13 }
 0x206   : > { %2371 = vst.msk [vmem:[%s3845_s21 + $0x34] sm:$0xf] %vm2357_vm6, %v2354_v19 }
 0x207   : > { %2372 = vst.msk [vmem:[%s3845_s21 + $0x38] sm:$0xf] %vm2357_vm6, %v2355_v25 }
 0x208   : > { %2373 = vst.msk [vmem:[%s3845_s21 + $0x3c] sm:$0xf] %vm2357_vm6, %v2356_v31 }
 0x209 PF: > { %s13_s12 = sadd.s32 1, %s3178_s12  }
 0x20a   : > { %p10_p4 = scmp.ge.s32.totalorder %s13_s12, 4  }
 0x20c   :  { %12 = sbr.rel (!%p10_p4) target bundleno = 1 (0x1), region = 70 }

</bundles_post_ra>
